<compile_context>
chip_gen: v7x
topology: tpu7x:2x2x1
jax: 0.10.0
libtpu: 0.0.40
codegen_flags: <defaults>
</compile_context>

<pallas_src>
import warnings
from functools import partial

import numpy as np
import jax
import jax.numpy as jnp
from jax import lax
from jax.experimental import pallas as pl
from jax.experimental.pallas import tpu as pltpu

# Donation of the wcat buffers is best-effort; silence the (harmless) warning
# if XLA declines to alias them on some backend.
warnings.filterwarnings("ignore", message="Some donated buffers were not usable")

INHIBITION_STRENGTH = 0.01
HEBB_LR = 1.0
HEBB_THRESHOLD = 0.5
HIDDEN = (256, 128, 64)                 # hidden sizes of the 3 hebbian layers
SCORE_OFFSETS = (0, 256, 384)           # lane offsets of each layer's score in the slab
SCORE_SLAB = 512                        # 256 + 128 + 64, padded to a multiple of 128


def _make_kernel(use_masks: bool):
    h1, h2, h3 = HIDDEN

    def kernel(*refs):
        if use_masks:
            (x_ref, wc1_ref, b1_ref, wc2_ref, b2_ref, wc3_ref, b3_ref,
             w4_ref, b4_ref, m1_ref, m2_ref, m3_ref,
             out_ref, wc1n_ref, wc2n_ref, wc3n_ref, s_ref) = refs
            m_refs = (m1_ref, m2_ref, m3_ref)
        else:
            (x_ref, wc1_ref, b1_ref, wc2_ref, b2_ref, wc3_ref, b3_ref,
             w4_ref, b4_ref,
             out_ref, wc1n_ref, wc2n_ref, wc3n_ref, s_ref) = refs
            m_refs = (None, None, None)

        x0 = x_ref[...]                      # (B, In0)
        inv_b = 1.0 / x0.shape[0]            # static python constant (batch mean)

        def hebb_layer(x, wcat_ref, b_ref, m_ref, wcat_new_ref, h, s_off):
            # ---- fused forward + hebbian projection: one (B, 2h) contraction ----
            zy = jnp.dot(x, wcat_ref[...], preferred_element_type=jnp.float32)
            x1 = jnp.maximum(zy[:, :h] + b_ref[...], 0.0)
            if m_ref is not None:            # masks folded into the activation
                x1 = x1 * m_ref[...]

            # ---- hebbian_update(x, i, lr=1, threshold=0.5) on the layer INPUT ----
            y = zy[:, h:]                                             # (B, h)
            ysum = jnp.sum(y, axis=1, keepdims=True)                  # (B, 1)
            y = jnp.maximum(y - INHIBITION_STRENGTH * (ysum - y), 0.0)
            theta = jnp.sum(y * y, axis=0, keepdims=True) * inv_b     # (1, h)
            # sum_b outer(y_b, x_b) in the transposed (In, h) layout: x^T @ y
            outer_sum = lax.dot_general(x, y, (((0,), (0,)), ((), ())),
                                        preferred_element_type=jnp.float32)

            # carry the unchanged forward weight into the aliased output buffer
            wcat_new_ref[:, :h] = wcat_ref[:, :h]
            # stage the un-normalized hebbian update through the output ref
            wh = wcat_ref[:, h:]
            wcat_new_ref[:, h:] = wh + HEBB_LR * (outer_sum - wh * theta)

            wh_new = wcat_new_ref[:, h:]
            norm = jnp.sqrt(jnp.sum(wh_new * wh_new, axis=0, keepdims=True))  # (1, h)
            wh_n = wh_new / norm                                      # per-neuron unit norm
            wcat_new_ref[:, h:] = wh_n

            score = jnp.sum(wh_n, axis=0, keepdims=True)              # (1, h)
            smin = jnp.min(score, axis=1, keepdims=True)
            smax = jnp.max(score, axis=1, keepdims=True)
            s_ref[:, s_off:s_off + h] = (score - smin) / (smax - smin + 1e-8)
            return x1

        x1 = hebb_layer(x0, wc1_ref, b1_ref, m_refs[0], wc1n_ref, h1, SCORE_OFFSETS[0])
        x2 = hebb_layer(x1, wc2_ref, b2_ref, m_refs[1], wc2n_ref, h2, SCORE_OFFSETS[1])
        x3 = hebb_layer(x2, wc3_ref, b3_ref, m_refs[2], wc3n_ref, h3, SCORE_OFFSETS[2])

        # zero the score-slab tail so the lane-padded (1, 512) output is defined
        s_ref[:, SCORE_OFFSETS[2] + h3:] = jnp.zeros(
            (1, SCORE_SLAB - SCORE_OFFSETS[2] - h3), jnp.float32)

        # ---- last layer: plain linear + relu (lane-padded to 128 outputs) ----
        z4 = jnp.dot(x3, w4_ref[...], preferred_element_type=jnp.float32) + b4_ref[...]
        out_ref[...] = jnp.maximum(z4, 0.0)

    return kernel


@partial(jax.jit, static_argnames=("output_size", "use_masks"), donate_argnums=(1,))
def _nn_forward_jit(x, wcats, w4p, bs, b4p, masks, *, output_size, use_masks):
    bsz = x.shape[0]
    wc1, wc2, wc3 = wcats
    b1, b2, b3 = bs
    inputs = [x, wc1, b1, wc2, b2, wc3, b3, w4p, b4p]
    if use_masks:
        inputs += list(masks)

    out_shapes = (
        jax.ShapeDtypeStruct((bsz, w4p.shape[1]), jnp.float32),   # lane-padded output
        jax.ShapeDtypeStruct(wc1.shape, jnp.float32),             # updated [W1 | Wh1]
        jax.ShapeDtypeStruct(wc2.shape, jnp.float32),             # updated [W2 | Wh2]
        jax.ShapeDtypeStruct(wc3.shape, jnp.float32),             # updated [W3 | Wh3]
        jax.ShapeDtypeStruct((1, SCORE_SLAB), jnp.float32),       # packed hebbian scores
    )

    res = pl.pallas_call(
        _make_kernel(use_masks),
        out_shape=out_shapes,
        # concatenated weight buffers (inputs 1/3/5) updated in place -> outputs 1/2/3
        input_output_aliases={1: 1, 3: 2, 5: 3},
        compiler_params=pltpu.CompilerParams(vmem_limit_bytes=8 * 1024 * 1024),
    )(*inputs)

    out_pad, wc1n, wc2n, wc3n, s_slab = res
    out = out_pad[:, :output_size]
    scores = tuple(s_slab[0, off:off + h] for off, h in zip(SCORE_OFFSETS, HIDDEN))
    hmasks = tuple(jnp.where(s < HEBB_THRESHOLD, 0.0, 1.0) for s in scores)
    return out, scores, hmasks, (wc1n, wc2n, wc3n)


def nn_forward(x, params, masks=None):
    """Functional equivalent of NN.forward as a single fused Pallas kernel.

    Returns (out, hebbian_scores, hebbian_masks, new_wcat).  new_wcat are the
    updated concatenated [W | Wh] weight buffers (the PyTorch module's in-place
    hebbian weight mutation, returned explicitly).  The wcat buffers in
    `params` are DONATED to the call: thread the returned new_wcat into the
    next step instead of reusing params["wcat"].
    """
    use_masks = masks is not None
    if use_masks:
        masks = tuple(jnp.asarray(m, jnp.float32).reshape(1, -1) for m in masks[:3])
    else:
        masks = None
    return _nn_forward_jit(
        jnp.asarray(x, jnp.float32),
        tuple(params["wcat"]), params["w4"], tuple(params["b"]), params["b4"],
        masks, output_size=params["output_size"], use_masks=use_masks)


def init_params(key, input_size, output_size):
    """Parameters matching the PyTorch module's init, in kernel-friendly layout.

    * Linear / hebbian weights are transposed to (in_features, out_features)
      and concatenated per hebbian layer as wcat = [W | Wh] of shape
      (in, 2*hidden) so the kernel runs one MXU contraction per layer.
    * The last layer's weight / bias are zero-padded to a 128-lane width.
    """
    dims = [input_size, *HIDDEN, output_size]
    params = {"wcat": [], "b": [], "output_size": output_size}
    for i in range(3):
        fan_in, fan_out = dims[i], dims[i + 1]
        key, kw, kb, kh = jax.random.split(key, 4)
        bound = 1.0 / np.sqrt(fan_in)
        w = jax.random.uniform(kw, (fan_in, fan_out), jnp.float32, -bound, bound)
        b = jax.random.uniform(kb, (fan_out,), jnp.float32, -bound, bound)
        # kaiming_normal_ on the (out, in) torch weight: std = sqrt(2 / fan_in)
        wh = jax.random.normal(kh, (fan_in, fan_out), jnp.float32) * np.sqrt(2.0 / fan_in)
        params["wcat"].append(jnp.concatenate([w, wh], axis=1))
        params["b"].append(b.reshape(1, -1))

    fan_in = dims[3]
    out_pad = -(-output_size // 128) * 128
    key, kw, kb = jax.random.split(key, 3)
    bound = 1.0 / np.sqrt(fan_in)
    w4 = jax.random.uniform(kw, (fan_in, output_size), jnp.float32, -bound, bound)
    b4 = jax.random.uniform(kb, (output_size,), jnp.float32, -bound, bound)
    params["w4"] = jnp.zeros((fan_in, out_pad), jnp.float32).at[:, :output_size].set(w4)
    params["b4"] = jnp.zeros((1, out_pad), jnp.float32).at[:, :output_size].set(b4)
    return params


if __name__ == "__main__":
    input_size, output_size, batch = 32, 8, 8
    key = jax.random.PRNGKey(0)
    key, kx = jax.random.split(key)
    params = init_params(key, input_size, output_size)
    x = jax.random.normal(kx, (batch, input_size), jnp.float32)

    out, scores, hmasks, new_wcat = nn_forward(x, params)
    jax.block_until_ready((out, scores, hmasks, new_wcat))

    # TODO(synk): PyTorch returns variable-length index tensors (torch.where);
    # dynamic shapes are not expressible in the kernel, so indices are derived
    # on the host from the fixed-size score vectors.
    hebbian_score_indices = [
        np.where(np.asarray(s) < HEBB_THRESHOLD)[0] for s in scores
    ]

    # updated hebbian weights in the transposed (in_features, hidden) layout
    new_wht = [np.asarray(wc[:, h:]) for wc, h in zip(new_wcat, HIDDEN)]

    assert out.shape == (batch, output_size)
    assert len(scores) == 3 and len(hmasks) == 3 and len(new_wcat) == 3
    assert scores[0].shape == (256,) and hmasks[1].shape == (128,)
    assert new_wht[0].shape == (input_size, 256)
    assert new_wht[2].shape == (128, 64)
    assert np.isfinite(np.asarray(out)).all()
    assert all(np.isfinite(np.asarray(s)).all() for s in scores)
    print("KERNEL_OK")
</pallas_src>

<mosaic_0001>
module attributes {stable_mosaic.version = 11 : i64} {
  func.func @kernel(%arg0: memref<8x32xf32, #tpu.memory_space<vmem>>, %arg1: memref<32x512xf32, #tpu.memory_space<vmem>>, %arg2: memref<1x256xf32, #tpu.memory_space<vmem>>, %arg3: memref<256x256xf32, #tpu.memory_space<vmem>>, %arg4: memref<1x128xf32, #tpu.memory_space<vmem>>, %arg5: memref<128x128xf32, #tpu.memory_space<vmem>>, %arg6: memref<1x64xf32, #tpu.memory_space<vmem>>, %arg7: memref<64x128xf32, #tpu.memory_space<vmem>>, %arg8: memref<1x128xf32, #tpu.memory_space<vmem>>, %arg9: memref<8x128xf32, #tpu.memory_space<vmem>>, %arg10: memref<32x512xf32, #tpu.memory_space<vmem>>, %arg11: memref<256x256xf32, #tpu.memory_space<vmem>>, %arg12: memref<128x128xf32, #tpu.memory_space<vmem>>, %arg13: memref<1x512xf32, #tpu.memory_space<vmem>>) attributes {dimension_semantics = [], scalar_prefetch = 0 : i64, scratch_operands = 0 : i64, tpu.core_type = #tpu.core_type<tc>} {
    %c0 = arith.constant 0 : index
    %c0_0 = arith.constant 0 : index
    %0 = vector.load %arg0[%c0, %c0_0] : memref<8x32xf32, #tpu.memory_space<vmem>>, vector<8x32xf32>
    %c0_1 = arith.constant 0 : index
    %c0_2 = arith.constant 0 : index
    %1 = vector.load %arg1[%c0_1, %c0_2] : memref<32x512xf32, #tpu.memory_space<vmem>>, vector<32x512xf32>
    %cst = arith.constant dense<0.000000e+00> : vector<8x512xf32>
    %2 = tpu.matmul %0, %1, %cst {dimension_numbers = #tpu.dot_dimension_numbers<[1], [0], [0], [1], [0, 0, 1, 1], [], []>} : vector<8x32xf32>, vector<32x512xf32>, vector<8x512xf32> -> vector<8x512xf32>
    %3 = vector.extract_strided_slice %2 {offsets = [0, 0], sizes = [8, 256], strides = [1, 1]} : vector<8x512xf32> to vector<8x256xf32>
    %c0_3 = arith.constant 0 : index
    %c0_4 = arith.constant 0 : index
    %4 = vector.load %arg2[%c0_3, %c0_4] : memref<1x256xf32, #tpu.memory_space<vmem>>, vector<1x256xf32>
    %5 = vector.broadcast %4 : vector<1x256xf32> to vector<8x256xf32>
    %6 = arith.addf %3, %5 : vector<8x256xf32>
    %cst_5 = arith.constant 0.000000e+00 : f32
    %7 = vector.broadcast %cst_5 : f32 to vector<8x256xf32>
    %8 = arith.maximumf %6, %7 : vector<8x256xf32>
    %9 = vector.extract_strided_slice %2 {offsets = [0, 256], sizes = [8, 256], strides = [1, 1]} : vector<8x512xf32> to vector<8x256xf32>
    %cst_6 = arith.constant dense<0.000000e+00> : vector<8xf32>
    %10 = vector.multi_reduction <add>, %9, %cst_6 [1] : vector<8x256xf32> to vector<8xf32>
    %11 = vector.shape_cast %10 : vector<8xf32> to vector<8x1xf32>
    %12 = vector.broadcast %11 : vector<8x1xf32> to vector<8x256xf32>
    %13 = arith.subf %12, %9 : vector<8x256xf32>
    %cst_7 = arith.constant 0.00999999977 : f32
    %14 = vector.broadcast %cst_7 : f32 to vector<8x256xf32>
    %15 = arith.mulf %14, %13 : vector<8x256xf32>
    %16 = arith.subf %9, %15 : vector<8x256xf32>
    %cst_8 = arith.constant 0.000000e+00 : f32
    %17 = vector.broadcast %cst_8 : f32 to vector<8x256xf32>
    %18 = arith.maximumf %16, %17 : vector<8x256xf32>
    %19 = arith.mulf %18, %18 : vector<8x256xf32>
    %cst_9 = arith.constant dense<0.000000e+00> : vector<256xf32>
    %20 = vector.multi_reduction <add>, %19, %cst_9 [0] : vector<8x256xf32> to vector<256xf32>
    %21 = vector.shape_cast %20 : vector<256xf32> to vector<1x256xf32>
    %cst_10 = arith.constant 1.250000e-01 : f32
    %22 = vector.broadcast %cst_10 : f32 to vector<1x256xf32>
    %23 = arith.mulf %21, %22 : vector<1x256xf32>
    %cst_11 = arith.constant dense<0.000000e+00> : vector<32x256xf32>
    %24 = tpu.matmul %0, %18, %cst_11 {dimension_numbers = #tpu.dot_dimension_numbers<[0], [0], [1], [1], [0, 1, 1, 1], [], []>} : vector<8x32xf32>, vector<8x256xf32>, vector<32x256xf32> -> vector<32x256xf32>
    %c0_12 = arith.constant 0 : index
    %c0_13 = arith.constant 0 : index
    %25 = vector.load %arg1[%c0_12, %c0_13] : memref<32x512xf32, #tpu.memory_space<vmem>>, vector<32x256xf32>
    %c0_14 = arith.constant 0 : index
    %c0_15 = arith.constant 0 : index
    %26 = vector.load %arg10[%c0_14, %c0_15] : memref<32x512xf32, #tpu.memory_space<vmem>>, vector<32x256xf32>
    tpu.vector_store %arg10[%c0_14, %c0_15], %25 {strides = array<i32>} : memref<32x512xf32, #tpu.memory_space<vmem>>, vector<32x256xf32>,
    %c0_16 = arith.constant 0 : index
    %c256 = arith.constant 256 : index
    %27 = vector.load %arg1[%c0_16, %c256] : memref<32x512xf32, #tpu.memory_space<vmem>>, vector<32x256xf32>
    %28 = vector.broadcast %23 : vector<1x256xf32> to vector<32x256xf32>
    %29 = arith.mulf %27, %28 : vector<32x256xf32>
    %30 = arith.subf %24, %29 : vector<32x256xf32>
    %cst_17 = arith.constant 1.000000e+00 : f32
    %31 = vector.broadcast %cst_17 : f32 to vector<32x256xf32>
    %32 = arith.mulf %31, %30 : vector<32x256xf32>
    %33 = arith.addf %27, %32 : vector<32x256xf32>
    %c0_18 = arith.constant 0 : index
    %c256_19 = arith.constant 256 : index
    %34 = vector.load %arg10[%c0_18, %c256_19] : memref<32x512xf32, #tpu.memory_space<vmem>>, vector<32x256xf32>
    tpu.vector_store %arg10[%c0_18, %c256_19], %33 {strides = array<i32>} : memref<32x512xf32, #tpu.memory_space<vmem>>, vector<32x256xf32>,
    %c0_20 = arith.constant 0 : index
    %c256_21 = arith.constant 256 : index
    %35 = vector.load %arg10[%c0_20, %c256_21] : memref<32x512xf32, #tpu.memory_space<vmem>>, vector<32x256xf32>
    %36 = arith.mulf %35, %35 : vector<32x256xf32>
    %cst_22 = arith.constant dense<0.000000e+00> : vector<256xf32>
    %37 = vector.multi_reduction <add>, %36, %cst_22 [0] : vector<32x256xf32> to vector<256xf32>
    %38 = vector.shape_cast %37 : vector<256xf32> to vector<1x256xf32>
    %39 = math.sqrt %38 : vector<1x256xf32>
    %40 = vector.broadcast %39 : vector<1x256xf32> to vector<32x256xf32>
    %41 = arith.divf %35, %40 : vector<32x256xf32>
    %c0_23 = arith.constant 0 : index
    %c256_24 = arith.constant 256 : index
    %42 = vector.load %arg10[%c0_23, %c256_24] : memref<32x512xf32, #tpu.memory_space<vmem>>, vector<32x256xf32>
    tpu.vector_store %arg10[%c0_23, %c256_24], %41 {strides = array<i32>} : memref<32x512xf32, #tpu.memory_space<vmem>>, vector<32x256xf32>,
    %cst_25 = arith.constant dense<0.000000e+00> : vector<256xf32>
    %43 = vector.multi_reduction <add>, %41, %cst_25 [0] : vector<32x256xf32> to vector<256xf32>
    %44 = vector.shape_cast %43 : vector<256xf32> to vector<1x256xf32>
    %cst_26 = arith.constant dense<0x7F800000> : vector<1xf32>
    %45 = vector.multi_reduction <minimumf>, %44, %cst_26 [1] : vector<1x256xf32> to vector<1xf32>
    %46 = vector.shape_cast %45 : vector<1xf32> to vector<1x1xf32>
    %cst_27 = arith.constant dense<0xFF800000> : vector<1xf32>
    %47 = vector.multi_reduction <maximumf>, %44, %cst_27 [1] : vector<1x256xf32> to vector<1xf32>
    %48 = vector.shape_cast %47 : vector<1xf32> to vector<1x1xf32>
    %49 = vector.broadcast %46 : vector<1x1xf32> to vector<1x256xf32>
    %50 = arith.subf %44, %49 : vector<1x256xf32>
    %51 = arith.subf %48, %46 : vector<1x1xf32>
    %cst_28 = arith.constant 9.99999993E-9 : f32
    %52 = vector.broadcast %cst_28 : f32 to vector<1x1xf32>
    %53 = arith.addf %51, %52 : vector<1x1xf32>
    %54 = vector.broadcast %53 : vector<1x1xf32> to vector<1x256xf32>
    %55 = arith.divf %50, %54 : vector<1x256xf32>
    %c0_29 = arith.constant 0 : index
    %c0_30 = arith.constant 0 : index
    %56 = vector.load %arg13[%c0_29, %c0_30] : memref<1x512xf32, #tpu.memory_space<vmem>>, vector<1x256xf32>
    tpu.vector_store %arg13[%c0_29, %c0_30], %55 {strides = array<i32>} : memref<1x512xf32, #tpu.memory_space<vmem>>, vector<1x256xf32>,
    %c0_31 = arith.constant 0 : index
    %c0_32 = arith.constant 0 : index
    %57 = vector.load %arg3[%c0_31, %c0_32] : memref<256x256xf32, #tpu.memory_space<vmem>>, vector<256x256xf32>
    %cst_33 = arith.constant dense<0.000000e+00> : vector<8x256xf32>
    %58 = tpu.matmul %8, %57, %cst_33 {dimension_numbers = #tpu.dot_dimension_numbers<[1], [0], [0], [1], [0, 0, 1, 1], [], []>} : vector<8x256xf32>, vector<256x256xf32>, vector<8x256xf32> -> vector<8x256xf32>
    %59 = vector.extract_strided_slice %58 {offsets = [0, 0], sizes = [8, 128], strides = [1, 1]} : vector<8x256xf32> to vector<8x128xf32>
    %c0_34 = arith.constant 0 : index
    %c0_35 = arith.constant 0 : index
    %60 = vector.load %arg4[%c0_34, %c0_35] : memref<1x128xf32, #tpu.memory_space<vmem>>, vector<1x128xf32>
    %61 = vector.broadcast %60 : vector<1x128xf32> to vector<8x128xf32>
    %62 = arith.addf %59, %61 : vector<8x128xf32>
    %cst_36 = arith.constant 0.000000e+00 : f32
    %63 = vector.broadcast %cst_36 : f32 to vector<8x128xf32>
    %64 = arith.maximumf %62, %63 : vector<8x128xf32>
    %65 = vector.extract_strided_slice %58 {offsets = [0, 128], sizes = [8, 128], strides = [1, 1]} : vector<8x256xf32> to vector<8x128xf32>
    %cst_37 = arith.constant dense<0.000000e+00> : vector<8xf32>
    %66 = vector.multi_reduction <add>, %65, %cst_37 [1] : vector<8x128xf32> to vector<8xf32>
    %67 = vector.shape_cast %66 : vector<8xf32> to vector<8x1xf32>
    %68 = vector.broadcast %67 : vector<8x1xf32> to vector<8x128xf32>
    %69 = arith.subf %68, %65 : vector<8x128xf32>
    %cst_38 = arith.constant 0.00999999977 : f32
    %70 = vector.broadcast %cst_38 : f32 to vector<8x128xf32>
    %71 = arith.mulf %70, %69 : vector<8x128xf32>
    %72 = arith.subf %65, %71 : vector<8x128xf32>
    %cst_39 = arith.constant 0.000000e+00 : f32
    %73 = vector.broadcast %cst_39 : f32 to vector<8x128xf32>
    %74 = arith.maximumf %72, %73 : vector<8x128xf32>
    %75 = arith.mulf %74, %74 : vector<8x128xf32>
    %cst_40 = arith.constant dense<0.000000e+00> : vector<128xf32>
    %76 = vector.multi_reduction <add>, %75, %cst_40 [0] : vector<8x128xf32> to vector<128xf32>
    %77 = vector.shape_cast %76 : vector<128xf32> to vector<1x128xf32>
    %cst_41 = arith.constant 1.250000e-01 : f32
    %78 = vector.broadcast %cst_41 : f32 to vector<1x128xf32>
    %79 = arith.mulf %77, %78 : vector<1x128xf32>
    %cst_42 = arith.constant dense<0.000000e+00> : vector<256x128xf32>
    %80 = tpu.matmul %8, %74, %cst_42 {dimension_numbers = #tpu.dot_dimension_numbers<[0], [0], [1], [1], [0, 1, 1, 1], [], []>} : vector<8x256xf32>, vector<8x128xf32>, vector<256x128xf32> -> vector<256x128xf32>
    %c0_43 = arith.constant 0 : index
    %c0_44 = arith.constant 0 : index
    %81 = vector.load %arg3[%c0_43, %c0_44] : memref<256x256xf32, #tpu.memory_space<vmem>>, vector<256x128xf32>
    %c0_45 = arith.constant 0 : index
    %c0_46 = arith.constant 0 : index
    %82 = vector.load %arg11[%c0_45, %c0_46] : memref<256x256xf32, #tpu.memory_space<vmem>>, vector<256x128xf32>
    tpu.vector_store %arg11[%c0_45, %c0_46], %81 {strides = array<i32>} : memref<256x256xf32, #tpu.memory_space<vmem>>, vector<256x128xf32>,
    %c0_47 = arith.constant 0 : index
    %c128 = arith.constant 128 : index
    %83 = vector.load %arg3[%c0_47, %c128] : memref<256x256xf32, #tpu.memory_space<vmem>>, vector<256x128xf32>
    %84 = vector.broadcast %79 : vector<1x128xf32> to vector<256x128xf32>
    %85 = arith.mulf %83, %84 : vector<256x128xf32>
    %86 = arith.subf %80, %85 : vector<256x128xf32>
    %cst_48 = arith.constant 1.000000e+00 : f32
    %87 = vector.broadcast %cst_48 : f32 to vector<256x128xf32>
    %88 = arith.mulf %87, %86 : vector<256x128xf32>
    %89 = arith.addf %83, %88 : vector<256x128xf32>
    %c0_49 = arith.constant 0 : index
    %c128_50 = arith.constant 128 : index
    %90 = vector.load %arg11[%c0_49, %c128_50] : memref<256x256xf32, #tpu.memory_space<vmem>>, vector<256x128xf32>
    tpu.vector_store %arg11[%c0_49, %c128_50], %89 {strides = array<i32>} : memref<256x256xf32, #tpu.memory_space<vmem>>, vector<256x128xf32>,
    %c0_51 = arith.constant 0 : index
    %c128_52 = arith.constant 128 : index
    %91 = vector.load %arg11[%c0_51, %c128_52] : memref<256x256xf32, #tpu.memory_space<vmem>>, vector<256x128xf32>
    %92 = arith.mulf %91, %91 : vector<256x128xf32>
    %cst_53 = arith.constant dense<0.000000e+00> : vector<128xf32>
    %93 = vector.multi_reduction <add>, %92, %cst_53 [0] : vector<256x128xf32> to vector<128xf32>
    %94 = vector.shape_cast %93 : vector<128xf32> to vector<1x128xf32>
    %95 = math.sqrt %94 : vector<1x128xf32>
    %96 = vector.broadcast %95 : vector<1x128xf32> to vector<256x128xf32>
    %97 = arith.divf %91, %96 : vector<256x128xf32>
    %c0_54 = arith.constant 0 : index
    %c128_55 = arith.constant 128 : index
    %98 = vector.load %arg11[%c0_54, %c128_55] : memref<256x256xf32, #tpu.memory_space<vmem>>, vector<256x128xf32>
    tpu.vector_store %arg11[%c0_54, %c128_55], %97 {strides = array<i32>} : memref<256x256xf32, #tpu.memory_space<vmem>>, vector<256x128xf32>,
    %cst_56 = arith.constant dense<0.000000e+00> : vector<128xf32>
    %99 = vector.multi_reduction <add>, %97, %cst_56 [0] : vector<256x128xf32> to vector<128xf32>
    %100 = vector.shape_cast %99 : vector<128xf32> to vector<1x128xf32>
    %cst_57 = arith.constant dense<0x7F800000> : vector<1xf32>
    %101 = vector.multi_reduction <minimumf>, %100, %cst_57 [1] : vector<1x128xf32> to vector<1xf32>
    %102 = vector.shape_cast %101 : vector<1xf32> to vector<1x1xf32>
    %cst_58 = arith.constant dense<0xFF800000> : vector<1xf32>
    %103 = vector.multi_reduction <maximumf>, %100, %cst_58 [1] : vector<1x128xf32> to vector<1xf32>
    %104 = vector.shape_cast %103 : vector<1xf32> to vector<1x1xf32>
    %105 = vector.broadcast %102 : vector<1x1xf32> to vector<1x128xf32>
    %106 = arith.subf %100, %105 : vector<1x128xf32>
    %107 = arith.subf %104, %102 : vector<1x1xf32>
    %cst_59 = arith.constant 9.99999993E-9 : f32
    %108 = vector.broadcast %cst_59 : f32 to vector<1x1xf32>
    %109 = arith.addf %107, %108 : vector<1x1xf32>
    %110 = vector.broadcast %109 : vector<1x1xf32> to vector<1x128xf32>
    %111 = arith.divf %106, %110 : vector<1x128xf32>
    %c0_60 = arith.constant 0 : index
    %c256_61 = arith.constant 256 : index
    %112 = vector.load %arg13[%c0_60, %c256_61] : memref<1x512xf32, #tpu.memory_space<vmem>>, vector<1x128xf32>
    tpu.vector_store %arg13[%c0_60, %c256_61], %111 {strides = array<i32>} : memref<1x512xf32, #tpu.memory_space<vmem>>, vector<1x128xf32>,
    %c0_62 = arith.constant 0 : index
    %c0_63 = arith.constant 0 : index
    %113 = vector.load %arg5[%c0_62, %c0_63] : memref<128x128xf32, #tpu.memory_space<vmem>>, vector<128x128xf32>
    %cst_64 = arith.constant dense<0.000000e+00> : vector<8x128xf32>
    %114 = tpu.matmul %64, %113, %cst_64 {dimension_numbers = #tpu.dot_dimension_numbers<[1], [0], [0], [1], [0, 0, 1, 1], [], []>} : vector<8x128xf32>, vector<128x128xf32>, vector<8x128xf32> -> vector<8x128xf32>
    %115 = vector.extract_strided_slice %114 {offsets = [0, 0], sizes = [8, 64], strides = [1, 1]} : vector<8x128xf32> to vector<8x64xf32>
    %c0_65 = arith.constant 0 : index
    %c0_66 = arith.constant 0 : index
    %116 = vector.load %arg6[%c0_65, %c0_66] : memref<1x64xf32, #tpu.memory_space<vmem>>, vector<1x64xf32>
    %117 = vector.broadcast %116 : vector<1x64xf32> to vector<8x64xf32>
    %118 = arith.addf %115, %117 : vector<8x64xf32>
    %cst_67 = arith.constant 0.000000e+00 : f32
    %119 = vector.broadcast %cst_67 : f32 to vector<8x64xf32>
    %120 = arith.maximumf %118, %119 : vector<8x64xf32>
    %121 = vector.extract_strided_slice %114 {offsets = [0, 64], sizes = [8, 64], strides = [1, 1]} : vector<8x128xf32> to vector<8x64xf32>
    %cst_68 = arith.constant dense<0.000000e+00> : vector<8xf32>
    %122 = vector.multi_reduction <add>, %121, %cst_68 [1] : vector<8x64xf32> to vector<8xf32>
    %123 = vector.shape_cast %122 : vector<8xf32> to vector<8x1xf32>
    %124 = vector.broadcast %123 : vector<8x1xf32> to vector<8x64xf32>
    %125 = arith.subf %124, %121 : vector<8x64xf32>
    %cst_69 = arith.constant 0.00999999977 : f32
    %126 = vector.broadcast %cst_69 : f32 to vector<8x64xf32>
    %127 = arith.mulf %126, %125 : vector<8x64xf32>
    %128 = arith.subf %121, %127 : vector<8x64xf32>
    %cst_70 = arith.constant 0.000000e+00 : f32
    %129 = vector.broadcast %cst_70 : f32 to vector<8x64xf32>
    %130 = arith.maximumf %128, %129 : vector<8x64xf32>
    %131 = arith.mulf %130, %130 : vector<8x64xf32>
    %cst_71 = arith.constant dense<0.000000e+00> : vector<64xf32>
    %132 = vector.multi_reduction <add>, %131, %cst_71 [0] : vector<8x64xf32> to vector<64xf32>
    %133 = vector.shape_cast %132 : vector<64xf32> to vector<1x64xf32>
    %cst_72 = arith.constant 1.250000e-01 : f32
    %134 = vector.broadcast %cst_72 : f32 to vector<1x64xf32>
    %135 = arith.mulf %133, %134 : vector<1x64xf32>
    %cst_73 = arith.constant dense<0.000000e+00> : vector<128x64xf32>
    %136 = tpu.matmul %64, %130, %cst_73 {dimension_numbers = #tpu.dot_dimension_numbers<[0], [0], [1], [1], [0, 1, 1, 1], [], []>} : vector<8x128xf32>, vector<8x64xf32>, vector<128x64xf32> -> vector<128x64xf32>
    %c0_74 = arith.constant 0 : index
    %c0_75 = arith.constant 0 : index
    %137 = vector.load %arg5[%c0_74, %c0_75] : memref<128x128xf32, #tpu.memory_space<vmem>>, vector<128x64xf32>
    %c0_76 = arith.constant 0 : index
    %c0_77 = arith.constant 0 : index
    %138 = vector.load %arg12[%c0_76, %c0_77] : memref<128x128xf32, #tpu.memory_space<vmem>>, vector<128x64xf32>
    tpu.vector_store %arg12[%c0_76, %c0_77], %137 {strides = array<i32>} : memref<128x128xf32, #tpu.memory_space<vmem>>, vector<128x64xf32>,
    %c0_78 = arith.constant 0 : index
    %c64 = arith.constant 64 : index
    %139 = vector.load %arg5[%c0_78, %c64] : memref<128x128xf32, #tpu.memory_space<vmem>>, vector<128x64xf32>
    %140 = vector.broadcast %135 : vector<1x64xf32> to vector<128x64xf32>
    %141 = arith.mulf %139, %140 : vector<128x64xf32>
    %142 = arith.subf %136, %141 : vector<128x64xf32>
    %cst_79 = arith.constant 1.000000e+00 : f32
    %143 = vector.broadcast %cst_79 : f32 to vector<128x64xf32>
    %144 = arith.mulf %143, %142 : vector<128x64xf32>
    %145 = arith.addf %139, %144 : vector<128x64xf32>
    %c0_80 = arith.constant 0 : index
    %c64_81 = arith.constant 64 : index
    %146 = vector.load %arg12[%c0_80, %c64_81] : memref<128x128xf32, #tpu.memory_space<vmem>>, vector<128x64xf32>
    tpu.vector_store %arg12[%c0_80, %c64_81], %145 {strides = array<i32>} : memref<128x128xf32, #tpu.memory_space<vmem>>, vector<128x64xf32>,
    %c0_82 = arith.constant 0 : index
    %c64_83 = arith.constant 64 : index
    %147 = vector.load %arg12[%c0_82, %c64_83] : memref<128x128xf32, #tpu.memory_space<vmem>>, vector<128x64xf32>
    %148 = arith.mulf %147, %147 : vector<128x64xf32>
    %cst_84 = arith.constant dense<0.000000e+00> : vector<64xf32>
    %149 = vector.multi_reduction <add>, %148, %cst_84 [0] : vector<128x64xf32> to vector<64xf32>
    %150 = vector.shape_cast %149 : vector<64xf32> to vector<1x64xf32>
    %151 = math.sqrt %150 : vector<1x64xf32>
    %152 = vector.broadcast %151 : vector<1x64xf32> to vector<128x64xf32>
    %153 = arith.divf %147, %152 : vector<128x64xf32>
    %c0_85 = arith.constant 0 : index
    %c64_86 = arith.constant 64 : index
    %154 = vector.load %arg12[%c0_85, %c64_86] : memref<128x128xf32, #tpu.memory_space<vmem>>, vector<128x64xf32>
    tpu.vector_store %arg12[%c0_85, %c64_86], %153 {strides = array<i32>} : memref<128x128xf32, #tpu.memory_space<vmem>>, vector<128x64xf32>,
    %cst_87 = arith.constant dense<0.000000e+00> : vector<64xf32>
    %155 = vector.multi_reduction <add>, %153, %cst_87 [0] : vector<128x64xf32> to vector<64xf32>
    %156 = vector.shape_cast %155 : vector<64xf32> to vector<1x64xf32>
    %cst_88 = arith.constant dense<0x7F800000> : vector<1xf32>
    %157 = vector.multi_reduction <minimumf>, %156, %cst_88 [1] : vector<1x64xf32> to vector<1xf32>
    %158 = vector.shape_cast %157 : vector<1xf32> to vector<1x1xf32>
    %cst_89 = arith.constant dense<0xFF800000> : vector<1xf32>
    %159 = vector.multi_reduction <maximumf>, %156, %cst_89 [1] : vector<1x64xf32> to vector<1xf32>
    %160 = vector.shape_cast %159 : vector<1xf32> to vector<1x1xf32>
    %161 = vector.broadcast %158 : vector<1x1xf32> to vector<1x64xf32>
    %162 = arith.subf %156, %161 : vector<1x64xf32>
    %163 = arith.subf %160, %158 : vector<1x1xf32>
    %cst_90 = arith.constant 9.99999993E-9 : f32
    %164 = vector.broadcast %cst_90 : f32 to vector<1x1xf32>
    %165 = arith.addf %163, %164 : vector<1x1xf32>
    %166 = vector.broadcast %165 : vector<1x1xf32> to vector<1x64xf32>
    %167 = arith.divf %162, %166 : vector<1x64xf32>
    %c0_91 = arith.constant 0 : index
    %c384 = arith.constant 384 : index
    %168 = vector.load %arg13[%c0_91, %c384] : memref<1x512xf32, #tpu.memory_space<vmem>>, vector<1x64xf32>
    tpu.vector_store %arg13[%c0_91, %c384], %167 {strides = array<i32>} : memref<1x512xf32, #tpu.memory_space<vmem>>, vector<1x64xf32>,
    %cst_92 = arith.constant 0.000000e+00 : f32
    %169 = vector.broadcast %cst_92 : f32 to vector<1x64xf32>
    %c0_93 = arith.constant 0 : index
    %c448 = arith.constant 448 : index
    %170 = vector.load %arg13[%c0_93, %c448] : memref<1x512xf32, #tpu.memory_space<vmem>>, vector<1x64xf32>
    tpu.vector_store %arg13[%c0_93, %c448], %169 {strides = array<i32>} : memref<1x512xf32, #tpu.memory_space<vmem>>, vector<1x64xf32>,
    %c0_94 = arith.constant 0 : index
    %c0_95 = arith.constant 0 : index
    %171 = vector.load %arg7[%c0_94, %c0_95] : memref<64x128xf32, #tpu.memory_space<vmem>>, vector<64x128xf32>
    %cst_96 = arith.constant dense<0.000000e+00> : vector<8x128xf32>
    %172 = tpu.matmul %120, %171, %cst_96 {dimension_numbers = #tpu.dot_dimension_numbers<[1], [0], [0], [1], [0, 0, 1, 1], [], []>} : vector<8x64xf32>, vector<64x128xf32>, vector<8x128xf32> -> vector<8x128xf32>
    %c0_97 = arith.constant 0 : index
    %c0_98 = arith.constant 0 : index
    %173 = vector.load %arg8[%c0_97, %c0_98] : memref<1x128xf32, #tpu.memory_space<vmem>>, vector<1x128xf32>
    %174 = vector.broadcast %173 : vector<1x128xf32> to vector<8x128xf32>
    %175 = arith.addf %172, %174 : vector<8x128xf32>
    %cst_99 = arith.constant 0.000000e+00 : f32
    %176 = vector.broadcast %cst_99 : f32 to vector<8x128xf32>
    %177 = arith.maximumf %175, %176 : vector<8x128xf32>
    %c0_100 = arith.constant 0 : index
    %c0_101 = arith.constant 0 : index
    %178 = vector.load %arg9[%c0_100, %c0_101] : memref<8x128xf32, #tpu.memory_space<vmem>>, vector<8x128xf32>
    tpu.vector_store %arg9[%c0_100, %c0_101], %177 {strides = array<i32>} : memref<8x128xf32, #tpu.memory_space<vmem>>, vector<8x128xf32>,
    return
  }
}

</mosaic_0001>

<bundles_post_ra>
// kernel: _nn_forward_jit.1
= control target key start
LH: loop header
LB: loop body
LE: loop exit
PB: predicated region body
PF: predicated region fallthrough
CT: control target
= control target key end

     0   :  { %19 = vsyncpa [#allocation3], 0  ;;  %s4261_s0 = inlined_call_operand.hbm [shape: f32[8,32], index: 0, kind: input, shape index: {}]   ;;  %s4262_s1 = inlined_call_operand.hbm [shape: f32[32,512], index: 1, kind: input, shape index: {}, may-alias: {1,10}]   ;;  %s4263_s2 = inlined_call_operand.vmem [shape: f32[1,256], index: 2, kind: input, shape index: {}]   ;;  %s4264_s3 = inlined_call_operand.hbm [shape: f32[256,256], index: 3, kind: input, shape index: {}, may-alias: {3,11}]   ;;  %s4265_s4 = inlined_call_operand.vmem [shape: f32[1,128], index: 4, kind: input, shape index: {}]   ;;  %s4266_s5 = inlined_call_operand.hbm [shape: f32[128,128], index: 5, kind: input, shape index: {}, may-alias: {5,12}]   ;;  %s4267_s6 = inlined_call_operand.vmem [shape: f32[1,64], index: 6, kind: input, shape index: {}]   ;;  %s4268_s7 = inlined_call_operand.hbm [shape: f32[64,128], index: 7, kind: input, shape index: {}]   ;;  %s4269_s8 = inlined_call_operand.vmem [shape: f32[1,128], index: 8, kind: input, shape index: {}]   ;;  %s4270_s9 = inlined_call_operand.hbm [shape: f32[8,128], index: 9, kind: output, shape index: {0}]   ;;  %s4271_s10 = inlined_call_operand.hbm [shape: f32[32,512], index: 10, kind: output, shape index: {1}, may-alias: {1,10}]   ;;  %s4272_s11 = inlined_call_operand.hbm [shape: f32[256,256], index: 11, kind: output, shape index: {2}, may-alias: {3,11}]   ;;  %s4273_s12 = inlined_call_operand.hbm [shape: f32[128,128], index: 12, kind: output, shape index: {3}, may-alias: {5,12}]   ;;  %s4274_s13 = inlined_call_operand.vmem [shape: f32[1,512], index: 13, kind: output, shape index: {4}]  }
   0x1   :  { %20 = vsyncpa [#allocation6], 0 }
   0x2   :  { %21 = vsyncpa [#allocation9], 0 }
   0x3   :  { %22 = vsyncpa [#allocation4], 0 }
   0x4   :  { %23 = vsyncpa [#allocation13], 0 }
   0x5   :  { %24 = vsyncpa [#allocation16], 0  ;;  %s3152_s25 = smov [#allocation5]   ;;  %s2942_s29 = scalar_lea.hbm %s4262_s1, 2048 }
   0x6   :  { %s40_s26 = sshll.u32 %s3152_s25, 4  ;;  %p2943_p0 = scmp.ne.s32.totalorder %s4262_s1, %s2942_s29  ;;  %s41_s26 = int_to_ptr.vmem [resolvable:$true] %s40_s26 }
   0x7   :  { %p2946_p1 = scmp.lt.u32.totalorder %s2942_s29, %s4262_s1 }
   0x9   :  { %p2948_p2 = pnand %p2946_p1, %p2943_p0 }
   0xb   :  { %2951 = shalt.err (!%p2948_p2)
}
   0xc   :  { %s2952_s17 = scalar_lea.vmem %s41_s26, 2048  ;;  %p2957_p4 = scmp.lt.s32.totalorder %s41_s26, %s41_s26 }
   0xd   :  { %p2953_p3 = scmp.ne.s32.totalorder %s41_s26, %s2952_s17  ;;  %p2958_p5 = scmp.lt.s32.totalorder %s2952_s17, %s2952_s17 }
   0xf   :  { %p2959_p6 = por %p2958_p5, %p2957_p4 }
  0x11   :  { %p2960_p7 = pnand %p2959_p6, %p2953_p3 }
  0x13   :  { %2963 = shalt.err (!%p2960_p7)
}
  0x14   :  { %s3153_s18 = smov 512   ;;  %s3154_s19 = smov 32  }
  0x15   :  { %46 = dma.hbm_to_vmem [thread:$0]  %s4262_s1, 2048, %s41_s26, [#allocation6], %s3153_s18, %s3153_s18, %s3154_s19  }
  0x16   :  { %s3155_s22 = smov [#allocation8]   ;;  %s2964_s27 = scalar_lea.hbm %s4266_s5, 2048 }
  0x17   :  { %s68_s23 = sshll.u32 %s3155_s22, 4  ;;  %p2965_p8 = scmp.ne.s32.totalorder %s4266_s5, %s2964_s27  ;;  %s69_s23 = int_to_ptr.vmem [resolvable:$true] %s68_s23 }
  0x18   :  { %p2968_p9 = scmp.lt.u32.totalorder %s2964_s27, %s4266_s5 }
  0x1a   :  { %p2970_p10 = pnand %p2968_p9, %p2965_p8 }
  0x1c   :  { %2973 = shalt.err (!%p2970_p10)
}
  0x1d   :  { %s2974_s15 = scalar_lea.vmem %s69_s23, 2048  ;;  %p2979_p12 = scmp.lt.s32.totalorder %s69_s23, %s69_s23 }
  0x1e   :  { %p2975_p11 = scmp.ne.s32.totalorder %s69_s23, %s2974_s15  ;;  %p2980_p13 = scmp.lt.s32.totalorder %s2974_s15, %s2974_s15 }
  0x20   :  { %p2981_p0 = por %p2980_p13, %p2979_p12 }
  0x22   :  { %p2982_p1 = pnand %p2981_p0, %p2975_p11 }
  0x24   :  { %2985 = shalt.err (!%p2982_p1)
}
  0x25   :  { %s3156_s1 = smov 128   ;;  %s3157_s26 = smov 8  }
  0x26   :  { %74 = dma.hbm_to_vmem [thread:$0]  %s4266_s5, 2048, %s69_s23, [#allocation9], %s3156_s1, %s3156_s1, %s3157_s26  }
  0x27   :  { %s3158_s20 = smov [#allocation2]   ;;  %s3159_s22 = smov [#allocation7]  }
  0x28   :  { %s31_s21 = sshll.u32 %s3158_s20, 4  ;;  %s54_s24 = sshll.u32 %s3159_s22, 4  ;;  %s32_s21 = int_to_ptr.vmem [resolvable:$true] %s31_s21  ;;  %s3272_s24 = int_to_ptr.vmem [resolvable:$true] %s54_s24 }
  0x29   :  { %s2986_s28 = scalar_lea.hbm %s4261_s0, 128 }
  0x2a   :  { %p2987_p2 = scmp.ne.s32.totalorder %s4261_s0, %s2986_s28  ;;  %p2990_p3 = scmp.lt.u32.totalorder %s2986_s28, %s4261_s0 }
  0x2c   :  { %p2992_p4 = pnand %p2990_p3, %p2987_p2 }
  0x2e   :  { %2995 = shalt.err (!%p2992_p4)
}
  0x2f   :  { %s2996_s5 = scalar_lea.vmem %s32_s21, 128  ;;  %p3001_p6 = scmp.lt.s32.totalorder %s32_s21, %s32_s21 }
  0x30   :  { %p2997_p5 = scmp.ne.s32.totalorder %s32_s21, %s2996_s5  ;;  %p3002_p7 = scmp.lt.s32.totalorder %s2996_s5, %s2996_s5 }
  0x32   :  { %p3003_p8 = por %p3002_p7, %p3001_p6 }
  0x34   :  { %p3004_p9 = pnand %p3003_p8, %p2997_p5 }
  0x36   :  { %3007 = shalt.err (!%p3004_p9)
}
  0x37   :  { %34 = dma.hbm_to_vmem [thread:$0]  %s4261_s0, 128, %s32_s21, [#allocation3]  }
  0x38   :  { %s3008_s22 = scalar_lea.hbm %s4264_s3, 8192 }
  0x39   :  { %p3009_p10 = scmp.ne.s32.totalorder %s4264_s3, %s3008_s22  ;;  %p3012_p11 = scmp.lt.u32.totalorder %s3008_s22, %s4264_s3 }
  0x3b   :  { %p3014_p12 = pnand %p3012_p11, %p3009_p10 }
  0x3d   :  { %3017 = shalt.err (!%p3014_p12)
}
  0x3e   :  { %s3018_s30 = scalar_lea.vmem %s3272_s24, 8192  ;;  %p3023_p0 = scmp.lt.s32.totalorder %s3272_s24, %s3272_s24 }
  0x3f   :  { %p3019_p13 = scmp.ne.s32.totalorder %s3272_s24, %s3018_s30  ;;  %p3024_p1 = scmp.lt.s32.totalorder %s3018_s30, %s3018_s30 }
  0x41   :  { %p3025_p2 = por %p3024_p1, %p3023_p0 }
  0x43   :  { %p3026_p3 = pnand %p3025_p2, %p3019_p13 }
  0x45   :  { %3029 = shalt.err (!%p3026_p3)
}
  0x46   :  { %s3160_s0 = smov 256   ;;  %s3161_s21 = smov 16  }
  0x47   :  { %60 = dma.hbm_to_vmem [thread:$0]  %s4264_s3, 8192, %s3272_s24, [#allocation6], %s3160_s0, %s3160_s0, %s3161_s21  }
  0x48   :  { %s3162_s5 = smov [#allocation10]   ;;  %s3030_s20 = scalar_lea.hbm %s4268_s7, 1024 }
  0x49   :  { %s82_s23 = sshll.u32 %s3162_s5, 4  ;;  %p3031_p4 = scmp.ne.s32.totalorder %s4268_s7, %s3030_s20  ;;  %s83_s23 = int_to_ptr.vmem [resolvable:$true] %s82_s23 }
  0x4a   :  { %p3034_p5 = scmp.lt.u32.totalorder %s3030_s20, %s4268_s7 }
  0x4c   :  { %p3036_p6 = pnand %p3034_p5, %p3031_p4 }
  0x4e   :  { %3039 = shalt.err (!%p3036_p6)
}
  0x4f   :  { %s3040_s29 = scalar_lea.vmem %s83_s23, 1024  ;;  %p3045_p8 = scmp.lt.s32.totalorder %s83_s23, %s83_s23 }
  0x50   :  { %p3041_p7 = scmp.ne.s32.totalorder %s83_s23, %s3040_s29  ;;  %p3046_p9 = scmp.lt.s32.totalorder %s3040_s29, %s3040_s29 }
  0x52   :  { %p3047_p10 = por %p3046_p9, %p3045_p8 }
  0x54   :  { %p3048_p11 = pnand %p3047_p10, %p3041_p7 }
  0x56   :  { %3051 = shalt.err (!%p3048_p11)
}
  0x57   :  { %88 = dma.hbm_to_vmem [thread:$0]  %s4268_s7, 1024, %s83_s23, [#allocation9], %s3156_s1, %s3156_s1, %s3157_s26  }
  0x58   :  { %3140 = dma.done.wait [#allocation3], 128  }
  0x59   :  { %3141 = vsyncadd [#allocation3], 4294967168 }
  0x5a   :  { %3142 = dma.done.wait [#allocation6], 10240  }
  0x5b   :  { %3143 = vsyncadd [#allocation6], 4294957056 }
  0x5c   :  { %3144 = dma.done.wait [#allocation9], 3072  }
  0x5d   :  { %3145 = vsyncadd [#allocation9], 4294964224  ;;  %v4277_v0 = vmov 0.0   ;;  %v108_v1 = vld [vmem:[#allocation5 + $0x8] sm:$0xff]  ;;  %v3323_v3 = vld [vmem:[#allocation5 + $0x18] sm:$0xff]  ;;  %vm123_vm0 = vcmask 261120  }
  0x5e   :  { %191 = vmatprep.mubr.f32.mxu0 %v4277_v0  ;;  %262 = vmatprep.mubr.f32.mxu1 %v4277_v0  ;;  %v112_v2 = vld [vmem:[#allocation5 + $0x28] sm:$0xff]  ;;  %v3325_v5 = vld [vmem:[#allocation5 + $0x38] sm:$0xff]  ;;  %v107_v6 = vld [vmem:[#allocation5] sm:$0xff]  ;;  %vm344_vm1 = vcmask 64512   ;;  %vm1710_vm2 = vcmask 523264   ;;  %vm3165_vm7 = vmmov 0  }
  0x5f   :  { %v2784_v4 = vpack.c.bf16 %v112_v2, %v108_v1  ;;  %v111_v7 = vld [vmem:[#allocation5 + $0x20] sm:$0xff]  ;;  %v2792_v8 = vpack.c.bf16 %v3325_v5, %v3323_v3  ;;  %v3329_v10 = vld [vmem:[#allocation5 + $0x10] sm:$0xff]  ;;  %v116_v12 = vld [vmem:[#allocation5 + $0x48] sm:$0xff]  ;;  %s3166_s5 = smov 64   ;;  %vm1719_vm10 = vcmask 1048064   ;;  %s3169_s17 = smov [#allocation11]  }
  0x60   :  { %v2786_v9 = vpack.c.bf16 %v111_v7, %v107_v6  ;;  %v3331_v11 = vld [vmem:[#allocation5 + $0x30] sm:$0xff]  ;;  %v120_v14 = vld [vmem:[#allocation5 + $0x68] sm:$0xff]  ;;  %v3335_v15 = vld [vmem:[#allocation5 + $0x58] sm:$0xff]  ;;  %s2458_s20 = sshll.u32 %s3169_s17, 4  ;;  %s4142_s20 = int_to_ptr.vmem [resolvable:$true] %s2458_s20 }
  0x61   :  { %2785 = vmatprep.subr.bf16.mxu0 %v2784_v4  ;;  %v2794_v13 = vpack.c.bf16 %v3331_v11, %v3329_v10  ;;  %v3337_v16 = vld [vmem:[#allocation5 + $0x78] sm:$0xff]  ;;  %2793 = vmatprep.subr.bf16.mxu1 %v2792_v8  ;;  %v2788_v17 = vpack.c.bf16 %v120_v14, %v116_v12  ;;  %v115_v19 = vld [vmem:[#allocation5 + $0x40] sm:$0xff]  ;;  %v3341_v21 = vld [vmem:[#allocation5 + $0x50] sm:$0xff] }
  0x62   :  { %2787 = vmatpush1.bf16.msra.mxu0 %v2786_v9  ;;  %v2796_v18 = vpack.c.bf16 %v3337_v16, %v3335_v15  ;;  %v119_v20 = vld [vmem:[#allocation5 + $0x60] sm:$0xff]  ;;  %v3343_v23 = vld [vmem:[#allocation5 + $0x70] sm:$0xff]  ;;  %v106_v24 = vld [vmem:[#allocation2] sm:$0xff] }
  0x63   :  { %2795 = vmatpush1.bf16.msra.mxu1 %v2794_v13  ;;  %v2790_v22 = vpack.c.bf16 %v119_v20, %v115_v19  ;;  %v3345_v25 = vld [vmem:[#allocation7 + $0x8] sm:$0xff]  ;;  %2789 = vmatprep.subr.bf16.mxu0 %v2788_v17  ;;  %v2798_v26 = vpack.c.bf16 %v3343_v23, %v3341_v21  ;;  %v3349_v27 = vld [vmem:[#allocation7 + $0x18] sm:$0xff]  ;;  %v622_v28 = vld [vmem:[#allocation7] sm:$0xff] }
  0x64   :  { %2797 = vmatprep.subr.bf16.mxu1 %v2796_v18  ;;  %v624_v29 = vld [vmem:[#allocation7 + $0x10] sm:$0xff]  ;;  %v2800_v30 = vpack.c.bf16 %v3349_v27, %v3345_v25  ;;  %v3353_v31 = vld [vmem:[#allocation7 + $0x28] sm:$0xff]  ;;  %v3355_v32 = vld [vmem:[#allocation7 + $0x38] sm:$0xff]  ;;  %312 = vxpose.xlu1.b32.start.end [1/1] (short) (narrow) %v106_v24, 32 }
  0x65   :  { %v2802_v33 = vpack.c.bf16 %v624_v29, %v622_v28  ;;  %v2804_v34 = vpack.c.bf16 %v3355_v32, %v3353_v31  ;;  %v626_v35 = vld [vmem:[#allocation7 + $0x20] sm:$0xff]  ;;  %v628_v36 = vld [vmem:[#allocation7 + $0x30] sm:$0xff]  ;;  %v3359_v37 = vld [vmem:[#allocation7 + $0x48] sm:$0xff] }
  0x66   :  { %2791 = vmatpush1.bf16.msra.mxu0 %v2790_v22  ;;  %v3361_v38 = vld [vmem:[#allocation7 + $0x58] sm:$0xff]  ;;  %v2806_v39 = vpack.c.bf16 %v628_v36, %v626_v35  ;;  %v630_v41 = vld [vmem:[#allocation7 + $0x40] sm:$0xff]  ;;  %v632_v42 = vld [vmem:[#allocation7 + $0x50] sm:$0xff] }
  0x67   :  { %2799 = vmatpush1.bf16.msra.mxu1 %v2798_v26  ;;  %v2808_v40 = vpack.c.bf16 %v3361_v38, %v3359_v37  ;;  %v3366_v43 = vld [vmem:[#allocation7 + $0x68] sm:$0xff]  ;;  %v3368_v44 = vld [vmem:[#allocation7 + $0x78] sm:$0xff]  ;;  %v2810_v45 = vpack.c.bf16 %v632_v42, %v630_v41  ;;  %v634_v47 = vld [vmem:[#allocation7 + $0x60] sm:$0xff] }
  0x68   :  { %2801 = vmatprep.subr.bf16.mxu1 %v2800_v30  ;;  %v2812_v46 = vpack.c.bf16 %v3368_v44, %v3366_v43  ;;  %v636_v48 = vld [vmem:[#allocation7 + $0x70] sm:$0xff]  ;;  %v3372_v49 = vld [vmem:[#allocation7 + $0x88] sm:$0xff]  ;;  %v3374_v50 = vld [vmem:[#allocation7 + $0x98] sm:$0xff] }
  0x69   :  { %2520 = vmatmul.mubr.msk.f32.vlgmr.msra.gmra.mrb[0].mxu0 %vm123_vm0, %v106_v24  ;;  %v2814_v51 = vpack.c.bf16 %v636_v48, %v634_v47  ;;  %v2816_v52 = vpack.c.bf16 %v3374_v50, %v3372_v49  ;;  %v638_v53 = vld [vmem:[#allocation7 + $0x80] sm:$0xff]  ;;  %v640_v54 = vld [vmem:[#allocation7 + $0x90] sm:$0xff]  ;;  %v3378_v55 = vld [vmem:[#allocation7 + $0xa8] sm:$0xff] }
  0x6a   :  { %2521 = vmatmul.mubr.msk.f32.vlgmr.msra.gmra.mrb[0].mxu1 %vm123_vm0, %v106_v24  ;;  %421 = vmatprep.mubr.f32.mxu0 %v4277_v0  ;;  %v3380_v56 = vld [vmem:[#allocation7 + $0xb8] sm:$0xff]  ;;  %v2818_v57 = vpack.c.bf16 %v640_v54, %v638_v53  ;;  %v642_v59 = vld [vmem:[#allocation7 + $0xa0] sm:$0xff]  ;;  %v644_v60 = vld [vmem:[#allocation7 + $0xb0] sm:$0xff] }
  0x6b   :  { %2803 = vmatpush1.bf16.msra.mxu1 %v2802_v33  ;;  %v2820_v58 = vpack.c.bf16 %v3380_v56, %v3378_v55  ;;  %v3384_v61 = vld [vmem:[#allocation7 + $0xc8] sm:$0xff]  ;;  %v3386_v62 = vld [vmem:[#allocation7 + $0xd8] sm:$0xff]  ;;  %v2822_v63 = vpack.c.bf16 %v644_v60, %v642_v59  ;;  %v646_v2 = vld [vmem:[#allocation7 + $0xc0] sm:$0xff] }
  0x6c   :  { %2805 = vmatprep.subr.bf16.mxu1 %v2804_v34  ;;  %4286 = vst [vmem:[#allocation23_spill] sm:$0xff] %v3384_v61  ;;  %4287 = vst [vmem:[#allocation24_spill] sm:$0xff] %v3386_v62  ;;  %v2824_v1 = vpack.c.bf16 %v3386_v62, %v3384_v61  ;;  %v648_v4 = vld [vmem:[#allocation7 + $0xd0] sm:$0xff]  ;;  %v651_v6 = vld [vmem:[#allocation7 + $0xe8] sm:$0xff] }
  0x6d   :  { %v3390_v7 = vld [vmem:[#allocation7 + $0xf8] sm:$0xff]  ;;  %v2826_v8 = vpack.c.bf16 %v648_v4, %v646_v2  ;;  %v650_v12 = vld [vmem:[#allocation7 + $0xe0] sm:$0xff]  ;;  %v652_v13 = vld [vmem:[#allocation7 + $0xf0] sm:$0xff] }
  0x6e   :  { %4288 = vst [vmem:[#allocation25_spill] sm:$0xff] %v3390_v7  ;;  %v2828_v9 = vpack.c.bf16 %v3390_v7, %v651_v6  ;;  %v655_v14 = vld [vmem:[#allocation7 + $0x108] sm:$0xff]  ;;  %v657_v17 = vld [vmem:[#allocation7 + $0x118] sm:$0xff]  ;;  %v2830_v18 = vpack.c.bf16 %v652_v13, %v650_v12  ;;  %v654_v20 = vld [vmem:[#allocation7 + $0x100] sm:$0xff] }
  0x6f   :  { %2807 = vmatpush1.bf16.msra.mxu1 %v2806_v39  ;;  %v2832_v19 = vpack.c.bf16 %v657_v17, %v655_v14  ;;  %v656_v22 = vld [vmem:[#allocation7 + $0x110] sm:$0xff]  ;;  %v659_v24 = vld [vmem:[#allocation7 + $0x128] sm:$0xff]  ;;  %v661_v26 = vld [vmem:[#allocation7 + $0x138] sm:$0xff] }
  0x70   :  { %2809 = vmatprep.subr.bf16.mxu1 %v2808_v40  ;;  %v2834_v28 = vpack.c.bf16 %v656_v22, %v654_v20  ;;  %v2836_v29 = vpack.c.bf16 %v661_v26, %v659_v24  ;;  %v658_v30 = vld [vmem:[#allocation7 + $0x120] sm:$0xff]  ;;  %v660_v33 = vld [vmem:[#allocation7 + $0x130] sm:$0xff]  ;;  %v663_v34 = vld [vmem:[#allocation7 + $0x148] sm:$0xff] }
  0x71   :  { %v665_v35 = vld [vmem:[#allocation7 + $0x158] sm:$0xff]  ;;  %v2838_v36 = vpack.c.bf16 %v660_v33, %v658_v30  ;;  %v662_v40 = vld [vmem:[#allocation7 + $0x140] sm:$0xff]  ;;  %v664_v41 = vld [vmem:[#allocation7 + $0x150] sm:$0xff] }
  0x72   :  { %v2840_v39 = vpack.c.bf16 %v665_v35, %v663_v34  ;;  %v667_v42 = vld [vmem:[#allocation7 + $0x168] sm:$0xff]  ;;  %v666_v48 = vld [vmem:[#allocation7 + $0x160] sm:$0xff]  ;;  %v673_v53 = vld [vmem:[#allocation7 + $0x198] sm:$0xff] }
  0x73   :  { %2811 = vmatpush1.bf16.msra.mxu1 %v2810_v45  ;;  %v669_v45 = vld [vmem:[#allocation7 + $0x178] sm:$0xff]  ;;  %v672_v59 = vld [vmem:[#allocation7 + $0x190] sm:$0xff]  ;;  %v675_v60 = vld [vmem:[#allocation7 + $0x1a8] sm:$0xff] }
  0x74   :  { %2813 = vmatprep.subr.bf16.mxu1 %v2812_v46  ;;  %v2842_v46 = vpack.c.bf16 %v664_v41, %v662_v40  ;;  %v2844_v47 = vpack.c.bf16 %v669_v45, %v667_v42  ;;  %v674_v4 = vld [vmem:[#allocation7 + $0x1a0] sm:$0xff]  ;;  %v676_v6 = vld [vmem:[#allocation7 + $0x1b0] sm:$0xff]  ;;  %v685_v20 = vld [vmem:[#allocation7 + $0x1f8] sm:$0xff] }
  0x75   :  { %v2854_v12 = vpack.c.bf16 %v676_v6, %v674_v4  ;;  %v678_v14 = vld [vmem:[#allocation7 + $0x1c0] sm:$0xff]  ;;  %v680_v17 = vld [vmem:[#allocation7 + $0x1d0] sm:$0xff]  ;;  %v269_v34 = vld [vmem:[%s4263_s2] sm:$0x3] }
  0x76   :  { %v682_v24 = vld [vmem:[#allocation7 + $0x1e0] sm:$0xff]  ;;  %v684_v26 = vld [vmem:[#allocation7 + $0x1f0] sm:$0xff] }
  0x77   :  { %2815 = vmatpush1.bf16.msra.mxu1 %v2814_v51  ;;  %v668_v51 = vld [vmem:[#allocation7 + $0x170] sm:$0xff] }
  0x78   :  { %2817 = vmatprep.subr.bf16.mxu1 %v2816_v52  ;;  %v671_v52 = vld [vmem:[#allocation7 + $0x188] sm:$0xff]  ;;  %v2846_v54 = vpack.c.bf16 %v668_v51, %v666_v48 }
  0x7b   :  { %2819 = vmatpush1.bf16.msra.mxu1 %v2818_v57  ;;  %v2848_v57 = vpack.c.bf16 %v673_v53, %v671_v52 }
  0x7c   :  { %2821 = vmatprep.subr.bf16.mxu1 %v2820_v58  ;;  %v670_v58 = vld [vmem:[#allocation7 + $0x180] sm:$0xff] }
  0x7f   :  { %2823 = vmatpush1.bf16.msra.mxu1 %v2822_v63  ;;  %v677_v63 = vld [vmem:[#allocation7 + $0x1b8] sm:$0xff] }
  0x80   :  { %2825 = vmatprep.subr.bf16.mxu1 %v2824_v1  ;;  %v2850_v1 = vpack.c.bf16 %v672_v59, %v670_v58  ;;  %v2852_v2 = vpack.c.bf16 %v677_v63, %v675_v60 }
  0x83   :  { %2827 = vmatpush1.bf16.msra.mxu1 %v2826_v8  ;;  %v679_v8 = vld [vmem:[#allocation7 + $0x1c8] sm:$0xff] }
  0x84   :  { %2829 = vmatprep.subr.bf16.mxu1 %v2828_v9  ;;  %v681_v9 = vld [vmem:[#allocation7 + $0x1d8] sm:$0xff] }
  0x85   :  { %v2856_v13 = vpack.c.bf16 %v681_v9, %v679_v8 }
  0x87   :  { %2831 = vmatpush1.bf16.msra.mxu1 %v2830_v18  ;;  %v2858_v18 = vpack.c.bf16 %v680_v17, %v678_v14  ;;  %v3414_v17 = vld [vmem:[#allocation8] sm:$0xff] }
  0x88   :  { %2833 = vmatprep.subr.bf16.mxu1 %v2832_v19  ;;  %v683_v19 = vld [vmem:[#allocation7 + $0x1e8] sm:$0xff]  ;;  %1957 = vst.msk [vmem:[#allocation15] sm:$0xff] %vm1710_vm2, %v3414_v17 }
  0x89   :  { %v2860_v22 = vpack.c.bf16 %v685_v20, %v683_v19  ;;  %v3420_v20 = vld [vmem:[#allocation8 + $0x10] sm:$0xff] }
  0x8a   :  { %1959 = vst.msk [vmem:[#allocation15 + $0x10] sm:$0xff] %vm1710_vm2, %v3420_v20 }
  0x8b   :  { %2835 = vmatpush1.bf16.msra.mxu1 %v2834_v28  ;;  %v2862_v28 = vpack.c.bf16 %v684_v26, %v682_v24  ;;  %v3424_v24 = vld [vmem:[#allocation8 + $0x20] sm:$0xff] }
  0x8c   :  { %2837 = vmatprep.subr.bf16.mxu1 %v2836_v29  ;;  %v4275_v29 = vlaneseq  ;;  %1961 = vst.msk [vmem:[#allocation15 + $0x20] sm:$0xff] %vm1710_vm2, %v3424_v24 }
  0x8e   :  { %v3394_v30 = vshrl.u32 %v4275_v29, 7 }
  0x8f   :  { %2839 = vmatpush1.bf16.msra.mxu1 %v2838_v36 }
  0x90   :  { %2841 = vmatprep.subr.bf16.mxu1 %v2840_v39  ;;  %4289 = vst [vmem:[#allocation26_spill] sm:$0xff] %v3394_v30  ;;  %v273_v33 = vsub.s32 0, %v3394_v30  ;;  %v277_v35 = vsub.s32 1, %v3394_v30 }
  0x92   :  { %v274_v36 = vrot.slane %v269_v34, %v273_v33  ;;  %v278_v39 = vrot.slane %v269_v34, %v277_v35  ;;  %v3440_v33 = vld [vmem:[#allocation8 + $0x30] sm:$0xff]  ;;  %v3442_v34 = vld [vmem:[#allocation8 + $0x38] sm:$0xff] }
  0x93   :  { %2843 = vmatpush1.bf16.msra.mxu1 %v2842_v46  ;;  %1963 = vst.msk [vmem:[#allocation15 + $0x30] sm:$0xff] %vm1710_vm2, %v3440_v33  ;;  %1964 = vst.msk [vmem:[#allocation15 + $0x38] sm:$0xff] %vm1710_vm2, %v3442_v34 }
  0x94   :  { %2845 = vmatprep.subr.bf16.mxu1 %v2844_v47 }
  0x97   :  { %2847 = vmatpush1.bf16.msra.mxu1 %v2846_v54 }
  0x98   :  { %2849 = vmatprep.subr.bf16.mxu1 %v2848_v57 }
  0x9b   :  { %2851 = vmatpush1.bf16.msra.mxu1 %v2850_v1 }
  0x9c   :  { %2853 = vmatprep.subr.bf16.mxu1 %v2852_v2 }
  0x9f   :  { %2855 = vmatpush1.bf16.msra.mxu1 %v2854_v12 }
  0xa0   :  { %2857 = vmatprep.subr.bf16.mxu1 %v2856_v13 }
  0xa3   :  { %2859 = vmatpush1.bf16.msra.mxu1 %v2858_v18  ;;  %v3416_v18 = vld [vmem:[#allocation8 + $0x8] sm:$0xff] }
  0xa4   :  { %2861 = vmatprep.subr.bf16.mxu1 %v2860_v22  ;;  %v3422_v22 = vld [vmem:[#allocation8 + $0x18] sm:$0xff]  ;;  %1958 = vst.msk [vmem:[#allocation15 + $0x8] sm:$0xff] %vm1710_vm2, %v3416_v18 }
  0xa5   :  { %1960 = vst.msk [vmem:[#allocation15 + $0x18] sm:$0xff] %vm1710_vm2, %v3422_v22 }
  0xa7   :  { %2863 = vmatpush1.bf16.msra.mxu1 %v2862_v28  ;;  %v3436_v28 = vld [vmem:[#allocation8 + $0x28] sm:$0xff] }
  0xa8   :  { %1962 = vst.msk [vmem:[#allocation15 + $0x28] sm:$0xff] %vm1710_vm2, %v3436_v28 }
  0xe4   :  { %v328_v58 = vpop.trf.xlu1 }
  0xe8   :  { %v329_v6 = vpop.trf.xlu1 }
  0xec   :  { %v330_v8 = vpop.trf.xlu1 }
  0xf0   :  { %v331_v9 = vpop.trf.xlu1 }
 0x13c   :  { %v193_v40 = vpop.f32.mrb[0].mxu0 }
 0x13d   :  { %v281_v41 = vadd.f32 %v274_v36, %v193_v40  ;;  %v264_v42 = vpop.f32.mrb[0].mxu1  ;;  %v195_v45 = vpop.f32.mrb[1].mxu0  ;;  %v3456_v40 = vld [vmem:[#allocation8 + $0x48] sm:$0xff] }
 0x13e   :  { %v282_v46 = vadd.f32 %v278_v39, %v195_v45  ;;  %v266_v47 = vpop.f32.mrb[1].mxu1  ;;  %v3454_v39 = vld [vmem:[#allocation8 + $0x40] sm:$0xff]  ;;  %1966 = vst.msk [vmem:[#allocation15 + $0x48] sm:$0xff] %vm1710_vm2, %v3456_v40 }
 0x13f   :  { %v283_v48 = vmax.f32 %v281_v41, 0.0  ;;  %v285_v51 = vadd.f32 %v266_v47, %v264_v42  ;;  %1965 = vst.msk [vmem:[#allocation15 + $0x40] sm:$0xff] %vm1710_vm2, %v3454_v39  ;;  %v3462_v41 = vld [vmem:[#allocation8 + $0x50] sm:$0xff] }
 0x140   :  { %v284_v52 = vmax.f32 %v282_v46, 0.0  ;;  %1967 = vst.msk [vmem:[#allocation15 + $0x50] sm:$0xff] %vm1710_vm2, %v3462_v41  ;;  %v3470_v46 = vld [vmem:[#allocation8 + $0x60] sm:$0xff] }
 0x141   :  { %286 = vadd.xlane.f32.xlu0 %v285_v51  ;;  %780 = vxpose.xlu1.b32.start.end [1/1] (short) %v283_v48, 128  ;;  %1969 = vst.msk [vmem:[#allocation15 + $0x60] sm:$0xff] %vm1710_vm2, %v3470_v46  ;;  %v3478_v51 = vld [vmem:[#allocation8 + $0x70] sm:$0xff] }
 0x142   :  { %750 = vmatprep.mubr.f32.mxu1 %v284_v52  ;;  %1971 = vst.msk [vmem:[#allocation15 + $0x70] sm:$0xff] %vm1710_vm2, %v3478_v51 }
 0x143   :  { %751 = vmatmul.mubr.f32.vlgmr.msra.gmra.mrb[2].mxu1 %v283_v48 }
 0x1c1   :  { %v796_v12 = vpop.trf.xlu1 }
 0x1c5   :  { %v797_v45 = vpop.trf.xlu1 }
 0x1c9   :  { %v798_v48 = vpop.trf.xlu1 }
 0x1ce   :  { %v287_v53 = vpop.xlane.xlu0 %286 }
 0x1cf   :  { %v288_v54 = vsub.f32 %v287_v53, %v264_v42  ;;  %v289_v57 = vsub.f32 %v287_v53, %v266_v47  ;;  %v799_v53 = vpop.trf.xlu1 }
 0x1d1   :  { %v290_v59 = vmul.f32 0.01, %v288_v54  ;;  %v291_v60 = vmul.f32 0.01, %v289_v57 }
 0x1d3   :  { %v292_v63 = vsub.f32 %v264_v42, %v290_v59  ;;  %v293_v1 = vsub.f32 %v266_v47, %v291_v60  ;;  %v3464_v42 = vld [vmem:[#allocation8 + $0x58] sm:$0xff]  ;;  %v3472_v47 = vld [vmem:[#allocation8 + $0x68] sm:$0xff]  ;;  %v800_v54 = vpop.trf.xlu1 }
 0x1d4   :  { %1968 = vst.msk [vmem:[#allocation15 + $0x58] sm:$0xff] %vm1710_vm2, %v3464_v42  ;;  %1970 = vst.msk [vmem:[#allocation15 + $0x68] sm:$0xff] %vm1710_vm2, %v3472_v47 }
 0x1d5   :  { %v294_v2 = vmax.f32 %v292_v63, 0.0  ;;  %v295_v4 = vmax.f32 %v293_v1, 0.0 }
 0x1d7   :  { %357 = vmatprep.subr.mxu0 %v295_v4  ;;  %v296_v57 = vmul.f32 %v294_v2, %v294_v2  ;;  %v3486_v59 = vpop.trf.xlu1 }
 0x1d8   :  { %358 = vmatpush1.msra.mxu0 %v294_v2 }
 0x1d9   :  { %2522 = vmatmul.mubr.msk.f32.vlgmr.msra.gmra.mrb[2].mxu0 %vm344_vm1, %v328_v58  ;;  %v297_v58 = vmul.f32 %v295_v4, %v295_v4  ;;  %v298_v60 = vrot.slane %v296_v57, 4 }
 0x1da   :  { %427 = vmatprep.mubr.f32.mxu0 %v4277_v0 }
 0x1db   :  { %v304_v63 = vrot.slane %v297_v58, 4  ;;  %v299_v1 = vadd.f32 %v298_v60, %v296_v57 }
 0x1dd   :  { %2523 = vmatmul.mubr.msk.f32.gmra.mrb[4].mxu0 %vm344_vm1, %v329_v6  ;;  %v3488_v6 = vpop.trf.xlu1 }
 0x1de   :  { %433 = vmatprep.mubr.f32.mxu0 %v4277_v0 }
 0x1e1   :  { %2524 = vmatmul.mubr.msk.f32.gmra.mrb[6].mxu0 %vm344_vm1, %v330_v8  ;;  %v305_v8 = vadd.f32 %v304_v63, %v297_v58  ;;  %v3490_v29 = vpop.trf.xlu1 }
 0x1e2   :  { %439 = vmatprep.mubr.f32.mxu0 %v4277_v0 }
 0x1e5   :  { %2525 = vmatmul.mubr.msk.f32.gmra.mrb[8].mxu0 %vm344_vm1, %v331_v9  ;;  %v300_v9 = vrot.slane %v299_v1, 2  ;;  %v3492_v26 = vpop.trf.xlu1 }
 0x1e6   :  { %2656 = vmatprep.mubr.msk.f32.mxu0 %vm344_vm1, %v796_v12  ;;  %v306_v12 = vrot.slane %v305_v8, 2 }
 0x1e7   :  { %v301_v0 = vadd.f32 %v300_v9, %v299_v1 }
 0x1e8   :  { %v307_v36 = vadd.f32 %v306_v12, %v305_v8 }
 0x1e9   :  { %v302_v35 = vrot.slane %v301_v0, 1  ;;  %v3494_v7 = vpop.trf.xlu1 }
 0x1ea   :  { %v308_v19 = vrot.slane %v307_v36, 1 }
 0x1eb   :  { %v303_v2 = vadd.f32 %v302_v35, %v301_v0 }
 0x1ec   :  { %v309_v4 = vadd.f32 %v308_v19, %v307_v36 }
 0x1ed   :  { %v310_v60 = vmul.f32 0.125, %v303_v2  ;;  %v3499_v1 = vpop.trf.xlu1 }
 0x1ee   :  { %v311_v58 = vmul.f32 0.125, %v309_v4 }
 0x1ef   :  { %v470_v62 = vmul.f32 %v310_v60, %v3329_v10 }
 0x1f0   :  { %v471_v0 = vmul.f32 %v311_v58, %v3323_v3 }
 0x216   :  { %v3409_v13 = vpop.f32.mrb[2].mxu1 }
 0x217   :  { %v3411_v14 = vpop.f32.mrb[3].mxu1 }
 0x218   :  { %766 = vadd.xlane.f32.xlu0 %v3411_v14 }
 0x245   :  { %812 = vxpose.xlu0.b32.start.end [1/1] (short) %v284_v52, 128  ;;  %v3480_v52 = vld [vmem:[#allocation8 + $0x78] sm:$0xff] }
 0x246   :  { %1972 = vst.msk [vmem:[#allocation15 + $0x78] sm:$0xff] %vm1710_vm2, %v3480_v52 }
 0x2a5   :  { %v767_v30 = vpop.xlane.xlu0 %766 }
 0x2a6   :  { %v768_v57 = vsub.f32 %v767_v30, %v3411_v14  ;;  %v472_v30 = vmul.f32 %v310_v60, %v3331_v11 }
 0x2a8   :  { %v769_v61 = vmul.f32 0.01, %v768_v57  ;;  %v807_v57 = vpop.trf.xlu1 }
 0x2aa   :  { %v770_v63 = vsub.f32 %v3411_v14, %v769_v61  ;;  %v473_v61 = vmul.f32 %v311_v58, %v3325_v5  ;;  %v3164_v14 = vmov 0.0|0.0  }
 0x2ac   :  { %v3501_v8 = vmax.f32 %v770_v63, 0.0  ;;  %v423_v9 = vpop.f32.mrb[2].mxu0  ;;  %v4290_v63 = vpack.c.bf16 %v3416_v18, %v3414_v17 }
 0x2ad   :  { %v478_v19 = vsub.f32 %v423_v9, %v470_v62  ;;  %v425_v35 = vpop.f32.mrb[3].mxu0 }
 0x2ae   :  { %v479_v36 = vsub.f32 %v425_v35, %v471_v0  ;;  %2654 = vmatprep.subr.mxu0 %v3501_v8  ;;  %v475_v35 = vmul.f32 %v311_v58, %v3335_v15 }
 0x2af   :  { %2655 = vmatpush3.msra.mxu0 %v3501_v8  ;;  %v3511_v2 = vadd.f32 %v478_v19, %v3329_v10  ;;  %v474_v10 = vmul.f32 %v310_v60, %v3341_v21 }
 0x2b0   :  { %v429_v12 = vpop.f32.mrb[4].mxu0  ;;  %2657 = vmatmul.mubr.msk.f32.vlgmr.msra.gmra.mrb[10].mxu0 %vm344_vm1, %v797_v45  ;;  %2864 = vmatprep.subr.bf16.mxu0 %v3164_v14  ;;  %v3518_v9 = vadd.f32 %v479_v36, %v3323_v3  ;;  %v4291_v36 = vpack.c.bf16 %v3422_v22, %v3420_v20  ;;  %v477_v22 = vmul.f32 %v311_v58, %v3337_v16 }
 0x2b1   :  { %v480_v62 = vsub.f32 %v429_v12, %v472_v30  ;;  %v431_v4 = vpop.f32.mrb[5].mxu0  ;;  %2659 = vmatprep.mubr.msk.f32.mxu0 %vm344_vm1, %v798_v48  ;;  %2866 = vmatpush3.bf16.msra.mxu0 %v4290_v63  ;;  %v510_v3 = vmul.f32 %v3511_v2, %v3511_v2  ;;  %v476_v12 = vmul.f32 %v310_v60, %v3343_v23 }
 0x2b2   :  { %v481_v0 = vsub.f32 %v431_v4, %v473_v61  ;;  %2867 = vmatprep.subr.bf16.mxu0 %v3164_v14  ;;  %v511_v30 = vmul.f32 %v3518_v9, %v3518_v9  ;;  %v4292_v60 = vpack.c.bf16 %v3436_v28, %v3424_v24 }
 0x2b3   :  { %v3522_v45 = vadd.f32 %v480_v62, %v3331_v11  ;;  %v808_v62 = vpop.trf.xlu1 }
 0x2b4   :  { %v3526_v19 = vadd.f32 %v481_v0, %v3325_v5  ;;  %v435_v48 = vpop.f32.mrb[6].mxu0  ;;  %2660 = vmatmul.mubr.msk.f32.gmra.mrb[12].mxu0 %vm344_vm1, %v799_v53 }
 0x2b5   :  { %v482_v17 = vsub.f32 %v435_v48, %v474_v10  ;;  %v437_v18 = vpop.f32.mrb[7].mxu0  ;;  %2662 = vmatprep.mubr.msk.f32.mxu0 %vm344_vm1, %v800_v54  ;;  %v512_v11 = vmul.f32 %v3522_v45, %v3522_v45  ;;  %2869 = vmatpush3.bf16.msra.mxu0 %v4291_v36 }
 0x2b6   :  { %v483_v5 = vsub.f32 %v437_v18, %v475_v35  ;;  %v513_v53 = vmul.f32 %v3526_v19, %v3526_v19  ;;  %2870 = vmatprep.subr.bf16.mxu0 %v3164_v14 }
 0x2b7   :  { %v3544_v54 = vadd.f32 %v482_v17, %v3341_v21  ;;  %v518_v61 = vadd.f32 %v512_v11, %v510_v3  ;;  %v809_v28 = vpop.trf.xlu1 }
 0x2b8   :  { %v3548_v4 = vadd.f32 %v483_v5, %v3335_v15  ;;  %v441_v20 = vpop.f32.mrb[8].mxu0  ;;  %v527_v63 = vadd.f32 %v513_v53, %v511_v30  ;;  %2663 = vmatmul.mubr.msk.f32.gmra.mrb[14].mxu0 %vm344_vm1, %v3486_v59 }
 0x2b9   :  { %v484_v0 = vsub.f32 %v441_v20, %v476_v12  ;;  %v514_v10 = vmul.f32 %v3544_v54, %v3544_v54  ;;  %v443_v21 = vpop.f32.mrb[9].mxu0  ;;  %2665 = vmatprep.mubr.msk.f32.mxu0 %vm344_vm1, %v3488_v6  ;;  %2872 = vmatpush3.bf16.msra.mxu0 %v4292_v60  ;;  %v4293_v6 = vpack.c.bf16 %v3442_v34, %v3440_v33 }
 0x2ba   :  { %v485_v15 = vsub.f32 %v443_v21, %v477_v22  ;;  %v515_v58 = vmul.f32 %v3548_v4, %v3548_v4  ;;  %2873 = vmatprep.subr.bf16.mxu0 %v3164_v14 }
 0x2bb   :  { %v3564_v59 = vadd.f32 %v484_v0, %v3343_v23  ;;  %v519_v48 = vadd.f32 %v518_v61, %v514_v10  ;;  %v2877_v23 = vpack.c.bf16 %v3456_v40, %v3454_v39  ;;  %v810_v40 = vpop.trf.xlu1 }
 0x2bc   :  { %v3567_v35 = vadd.f32 %v485_v15, %v3337_v16  ;;  %v528_v17 = vadd.f32 %v527_v63, %v515_v58  ;;  %2666 = vmatmul.mubr.msk.f32.gmra.mrb[16].mxu0 %vm344_vm1, %v3490_v29 }
 0x2bd   :  { %v516_v24 = vmul.f32 %v3564_v59, %v3564_v59  ;;  %2668 = vmatprep.mubr.msk.f32.mxu0 %vm344_vm1, %v3492_v26  ;;  %2875 = vmatpush3.bf16.msra.mxu0 %v4293_v6  ;;  %v2880_v26 = vpack.c.bf16 %v3464_v42, %v3462_v41 }
 0x2be   :  { %v517_v16 = vmul.f32 %v3567_v35, %v3567_v35  ;;  %2876 = vmatprep.subr.bf16.mxu0 %v3164_v14 }
 0x2bf   :  { %v520_v29 = vadd.f32 %v519_v48, %v516_v24  ;;  %v811_v20 = vpop.trf.xlu1 }
 0x2c0   :  { %v529_v18 = vadd.f32 %v528_v17, %v517_v16  ;;  %2669 = vmatmul.mubr.msk.f32.gmra.mrb[18].mxu0 %vm344_vm1, %v3494_v7  ;;  %v2883_v7 = vpack.c.bf16 %v3472_v47, %v3470_v46 }
 0x2c1   :  { %v521_v3 = vrot.slane %v520_v29, 4  ;;  %2671 = vmatprep.mubr.msk.f32.mxu0 %vm344_vm1, %v3499_v1  ;;  %2878 = vmatpush3.bf16.msra.mxu0 %v2877_v23 }
 0x2c2   :  { %v530_v33 = vrot.slane %v529_v18, 4  ;;  %2879 = vmatprep.subr.bf16.mxu0 %v3164_v14 }
 0x2c3   :  { %v522_v34 = vadd.f32 %v521_v3, %v520_v29 }
 0x2c4   :  { %v531_v11 = vadd.f32 %v530_v33, %v529_v18  ;;  %2672 = vmatmul.mubr.msk.f32.gmra.mrb[20].mxu0 %vm344_vm1, %v807_v57  ;;  %v2886_v57 = vpack.c.bf16 %v3480_v52, %v3478_v51 }
 0x2c5   :  { %v523_v36 = vrot.slane %v522_v34, 2  ;;  %v828_v5 = vpop.trf.xlu0  ;;  %2674 = vmatprep.mubr.msk.f32.mxu0 %vm344_vm1, %v808_v62  ;;  %2881 = vmatpush3.bf16.msra.mxu0 %v2880_v26 }
 0x2c6   :  { %v532_v1 = vrot.slane %v531_v11, 2  ;;  %2882 = vmatprep.subr.bf16.mxu0 %v3164_v14 }
 0x2c7   :  { %v524_v30 = vadd.f32 %v523_v36, %v522_v34 }
 0x2c8   :  { %v533_v53 = vadd.f32 %v532_v1, %v531_v11  ;;  %2675 = vmatmul.mubr.msk.f32.gmra.mrb[22].mxu0 %vm344_vm1, %v809_v28 }
 0x2c9   :  { %v525_v12 = vrot.slane %v524_v30, 1  ;;  %v829_v61 = vpop.trf.xlu0  ;;  %2677 = vmatprep.mubr.msk.f32.mxu0 %vm344_vm1, %v810_v40  ;;  %2884 = vmatpush3.bf16.msra.mxu0 %v2883_v7 }
 0x2ca   :  { %v534_v62 = vrot.slane %v533_v53, 1  ;;  %2885 = vmatprep.subr.bf16.mxu0 %v3164_v14 }
 0x2cb   :  { %v526_v22 = vadd.f32 %v525_v12, %v524_v30 }
 0x2cc   :  { %v535_v63 = vadd.f32 %v534_v62, %v533_v53  ;;  %2678 = vmatmul.mubr.msk.f32.gmra.mrb[24].mxu0 %vm344_vm1, %v811_v20 }
 0x2cd   :  { %2920 = vrsqrt.f32 %v526_v22  ;;  %2680 = vmatprep.mubr.msk.f32.mxu0 %vm344_vm1, %v828_v5  ;;  %v830_v0 = vpop.trf.xlu0  ;;  %2887 = vmatpush3.bf16.msra.mxu0 %v2886_v57  ;;  %vm538_vm3 = vcmp.eq.f32.partialorder %v526_v22, inf  ;;  %v541_v48 = vand.u32 2147483648, %v526_v22  ;;  %vm540_vm4 = vcmp.eq.f32.partialorder %v526_v22, 0.0  ;;  %v2526_v57 = vld [vmem:[%s4265_s4] ss:$0 sm:$0xff] }
 0x2ce   :  { %2922 = vrsqrt.f32 %v535_v63  ;;  %2888 = vmatprep.subr.bf16.mxu0 %v3164_v14  ;;  %vm545_vm5 = vcmp.eq.f32.partialorder %v535_v63, inf  ;;  %v548_v6 = vand.u32 2147483648, %v535_v63  ;;  %vm547_vm6 = vcmp.eq.f32.partialorder %v535_v63, 0.0 }
 0x2d0   :  { %2681 = vmatmul.mubr.msk.f32.gmra.mrb[26].mxu0 %vm344_vm1, %v829_v61 }
 0x2d1   :  { %2683 = vmatprep.mubr.msk.f32.mxu0 %vm344_vm1, %v830_v0  ;;  %v831_v10 = vpop.trf.xlu0  ;;  %v4294_v0 = vmov 0.0  }
 0x2d4   :  { %2684 = vmatmul.mubr.msk.f32.gmra.mrb[28].mxu0 %vm344_vm1, %v831_v10 }
 0x2d5   :  { %v832_v21 = vpop.trf.xlu0 }
 0x2d6   :  { %2686 = vmatprep.mubr.msk.f32.mxu0 %vm344_vm1, %v832_v21  ;;  %v2362_v21 = vld [vmem:[#allocation10] sm:$0xff] }
 0x2d7   :  { %v2921_v60 = vpop.eup %2920 }
 0x2d8   :  { %v2923_v15 = vpop.eup %2922  ;;  %v537_v58 = vmul.f32 %v2921_v60, %v526_v22  ;;  %v2363_v60 = vld [vmem:[#allocation10 + $0x8] sm:$0xff] }
 0x2d9   :  { %v544_v17 = vmul.f32 %v2923_v15, %v535_v63  ;;  %v833_v24 = vpop.trf.xlu0  ;;  %v2364_v15 = vld [vmem:[#allocation10 + $0x10] sm:$0xff] }
 0x2da   :  { %v539_v28 = vsel %vm538_vm3, %v526_v22, %v537_v58  ;;  %2687 = vmatmul.mubr.msk.f32.gmra.mrb[30].mxu0 %vm344_vm1, %v833_v24  ;;  %v3633_v22 = vadd.f32 %v2526_v57, %v3409_v13  ;;  %v2889_v58 = vpack.c.bf16 %v2363_v60, %v2362_v21  ;;  %v2367_v24 = vld [vmem:[#allocation10 + $0x28] sm:$0xff] }
 0x2db   :  { %v542_v23 = vsel %vm540_vm4, %v541_v48, %v539_v28  ;;  %v546_v16 = vsel %vm545_vm5, %v535_v63, %v544_v17  ;;  %v2365_v48 = vld [vmem:[#allocation10 + $0x18] sm:$0xff]  ;;  %v2366_v17 = vld [vmem:[#allocation10 + $0x20] sm:$0xff] }
 0x2dc   :  { %2924 = vrcp.f32 %v542_v23  ;;  %v549_v29 = vsel %vm547_vm6, %v548_v6, %v546_v16  ;;  %v765_v10 = vmax.f32 %v3633_v22, 0.0  ;;  %v2892_v13 = vpack.c.bf16 %v2365_v48, %v2364_v15  ;;  %v2368_v23 = vld [vmem:[#allocation10 + $0x30] sm:$0xff]  ;;  %v2369_v16 = vld [vmem:[#allocation10 + $0x38] sm:$0xff] }
 0x2dd   :  { %2926 = vrcp.f32 %v549_v29  ;;  %v834_v18 = vpop.trf.xlu0  ;;  %v2895_v28 = vpack.c.bf16 %v2367_v24, %v2366_v17  ;;  %v772_v6 = vmul.f32 %v3501_v8, %v3501_v8  ;;  %v2898_v29 = vpack.c.bf16 %v2369_v16, %v2368_v23 }
 0x2de   :  { %2689 = vmatprep.mubr.msk.f32.mxu0 %vm344_vm1, %v834_v18 }
 0x2df   :  { %v773_v18 = vrot.slane %v772_v6, 4 }
 0x2e1   :  { %v835_v3 = vpop.trf.xlu0 }
 0x2e2   :  { %2690 = vmatmul.mubr.msk.f32.gmra.mrb[32].mxu0 %vm344_vm1, %v835_v3  ;;  %v774_v3 = vadd.f32 %v773_v18, %v772_v6 }
 0x2e5   :  { %v836_v26 = vpop.trf.xlu0 }
 0x2e6   :  { %v2925_v33 = vpop.eup %2924  ;;  %2692 = vmatprep.mubr.msk.f32.mxu0 %vm344_vm1, %v836_v26  ;;  %v775_v26 = vrot.slane %v774_v3, 2 }
 0x2e7   :  { %v2927_v34 = vpop.eup %2926  ;;  %v558_v40 = vmul.f32 %v2925_v33, %v3564_v59  ;;  %v551_v11 = vmul.f32 %v2925_v33, %v3511_v2  ;;  %v554_v36 = vmul.f32 %v2925_v33, %v3522_v45  ;;  %v556_v5 = vmul.f32 %v2925_v33, %v3544_v54 }
 0x2e8   :  { %v559_v7 = vmul.f32 %v2927_v34, %v3567_v35  ;;  %v553_v1 = vmul.f32 %v2927_v34, %v3518_v9  ;;  %v555_v30 = vmul.f32 %v2927_v34, %v3526_v19  ;;  %v557_v53 = vmul.f32 %v2927_v34, %v3548_v4 }
 0x2e9   :  { %566 = vst [vmem:[#allocation12 + $0x70] sm:$0xff] %v558_v40  ;;  %v837_v12 = vpop.trf.xlu0  ;;  %560 = vst [vmem:[#allocation12 + $0x10] sm:$0xff] %v551_v11  ;;  %v568_v59 = vadd.f32 %v554_v36, %v551_v11  ;;  %v776_v33 = vadd.f32 %v775_v26, %v774_v3 }
 0x2ea   :  { %562 = vst [vmem:[#allocation12 + $0x30] sm:$0xff] %v554_v36  ;;  %564 = vst [vmem:[#allocation12 + $0x50] sm:$0xff] %v556_v5  ;;  %2693 = vmatmul.mubr.msk.f32.gmra.mrb[34].mxu0 %vm344_vm1, %v837_v12  ;;  %v577_v2 = vadd.f32 %v555_v30, %v553_v1 }
 0x2eb   :  { %567 = vst [vmem:[#allocation12 + $0x78] sm:$0xff] %v559_v7  ;;  %561 = vst [vmem:[#allocation12 + $0x18] sm:$0xff] %v553_v1  ;;  %v569_v45 = vadd.f32 %v568_v59, %v556_v5  ;;  %v777_v34 = vrot.slane %v776_v33, 1 }
 0x2ec   :  { %563 = vst [vmem:[#allocation12 + $0x38] sm:$0xff] %v555_v30  ;;  %565 = vst [vmem:[#allocation12 + $0x58] sm:$0xff] %v557_v53  ;;  %v578_v54 = vadd.f32 %v577_v2, %v557_v53 }
 0x2ed   :  { %v838_v9 = vpop.trf.xlu0  ;;  %v3620_v35 = vadd.f32 %v569_v45, %v558_v40  ;;  %v778_v40 = vadd.f32 %v777_v34, %v776_v33 }
 0x2ee   :  { %2695 = vmatprep.mubr.msk.f32.mxu0 %vm344_vm1, %v838_v9  ;;  %v3623_v19 = vadd.f32 %v578_v54, %v559_v7 }
 0x2ef   :  { %v3646_v11 = vmul.f32 0.125, %v778_v40 }
 0x2f1   :  { %v839_v4 = vpop.trf.xlu0  ;;  %v1262_v36 = vmul.f32 %v3646_v11, %v3349_v27  ;;  %v1261_v8 = vmul.f32 %v3646_v11, %v3345_v25  ;;  %v1264_v53 = vmul.f32 %v3646_v11, %v3355_v32  ;;  %v1263_v2 = vmul.f32 %v3646_v11, %v3353_v31 }
 0x2f2   :  { %2696 = vmatmul.mubr.msk.f32.gmra.mrb[36].mxu0 %vm344_vm1, %v839_v4  ;;  %v1268_v48 = vmul.f32 %v3646_v11, %v3368_v44  ;;  %v1270_v3 = vmul.f32 %v3646_v11, %v3374_v50  ;;  %v1269_v26 = vmul.f32 %v3646_v11, %v3372_v49 }
 0x2f5   :  { %v840_v61 = vpop.trf.xlu0 }
 0x2f6   :  { %2698 = vmatprep.mubr.msk.f32.mxu0 %vm344_vm1, %v840_v61  ;;  %v1266_v61 = vmul.f32 %v3646_v11, %v3361_v38 }
 0x2f9   :  { %v841_v20 = vpop.trf.xlu0 }
 0x2fa   :  { %2699 = vmatmul.mubr.msk.f32.gmra.mrb[38].mxu0 %vm344_vm1, %v841_v20 }
 0x2fd   :  { %v842_v62 = vpop.trf.xlu0 }
 0x2fe   :  { %2701 = vmatprep.mubr.msk.f32.mxu0 %vm344_vm1, %v842_v62  ;;  %v1265_v62 = vmul.f32 %v3646_v11, %v3359_v37 }
 0x301   :  { %v843_v63 = vpop.trf.xlu0 }
 0x302   :  { %2702 = vmatmul.mubr.msk.f32.gmra.mrb[40].mxu0 %vm344_vm1, %v843_v63 }
 0x303   :  { %2736 = vmatprep.mubr.msk.f32.mxu0 %vm3165_vm7, %v4294_v0 }
 0x306   :  { %2737 = vmatmul.mubr.f32.vlgmr.msra.gmra.mrb[42].mxu0 %v765_v10 }
 0x307   :  { %2781 = vmatprep.mubr.msk.f32.mxu0 %vm3165_vm7, %v4294_v0  ;;  %2890 = vmatpush3.bf16.msra.mxu0 %v2889_v58 }
 0x308   :  { %2891 = vmatprep.subr.bf16.mxu0 %v3164_v14 }
 0x30b   :  { %2893 = vmatpush3.bf16.msra.mxu0 %v2892_v13 }
 0x30c   :  { %2894 = vmatprep.subr.bf16.mxu0 %v3164_v14 }
 0x30f   :  { %2896 = vmatpush3.bf16.msra.mxu0 %v2895_v28 }
 0x310   :  { %2897 = vmatprep.subr.bf16.mxu0 %v3164_v14 }
 0x313   :  { %2899 = vmatpush3.bf16.msra.mxu0 %v2898_v29 }
 0x383   :  { %v2658_v5 = vpop.f32.mrb[10].mxu0 }
 0x384   :  { %v1294_v14 = vsub.f32 %v2658_v5, %v1262_v36  ;;  %v1006_v7 = vpop.f32.mrb[11].mxu0 }
 0x385   :  { %v1293_v1 = vsub.f32 %v1006_v7, %v1261_v8 }
 0x386   :  { %v3653_v30 = vadd.f32 %v1294_v14, %v3349_v27 }
 0x387   :  { %v3658_v12 = vadd.f32 %v1293_v1, %v3345_v25  ;;  %v2661_v59 = vpop.f32.mrb[12].mxu0  ;;  %v1272_v1 = vmul.f32 %v3646_v11, %v3380_v56 }
 0x388   :  { %v1296_v45 = vsub.f32 %v2661_v59, %v1264_v53  ;;  %v1016_v54 = vpop.f32.mrb[13].mxu0  ;;  %v1422_v9 = vmul.f32 %v3653_v30, %v3653_v30  ;;  %v1271_v53 = vmul.f32 %v3646_v11, %v3378_v55 }
 0x389   :  { %v1421_v4 = vmul.f32 %v3658_v12, %v3658_v12  ;;  %v1295_v27 = vsub.f32 %v1016_v54, %v1263_v2 }
 0x38a   :  { %v3669_v20 = vadd.f32 %v1296_v45, %v3355_v32  ;;  %v1267_v32 = vmul.f32 %v3646_v11, %v3366_v43 }
 0x38b   :  { %v3672_v25 = vadd.f32 %v1295_v27, %v3353_v31  ;;  %v2664_v57 = vpop.f32.mrb[14].mxu0  ;;  %v1453_v60 = vadd.f32 %v1422_v9, %v1421_v4 }
 0x38c   :  { %v1298_v63 = vsub.f32 %v2664_v57, %v1266_v61  ;;  %v1026_v21 = vpop.f32.mrb[15].mxu0  ;;  %v1424_v31 = vmul.f32 %v3669_v20, %v3669_v20  ;;  %v4295_v57 = vld [vmem:[#allocation24_spill] sm:$0xff] }
 0x38d   :  { %v1423_v15 = vmul.f32 %v3672_v25, %v3672_v25  ;;  %v1297_v58 = vsub.f32 %v1026_v21, %v1265_v62  ;;  %v1274_v62 = vmul.f32 %v3646_v11, %v4295_v57 }
 0x38e   :  { %v3685_v17 = vadd.f32 %v1298_v63, %v3361_v38  ;;  %v4296_v63 = vld [vmem:[#allocation23_spill] sm:$0xff] }
 0x38f   :  { %v1454_v13 = vadd.f32 %v1453_v60, %v1423_v15  ;;  %v3688_v24 = vadd.f32 %v1297_v58, %v3359_v37  ;;  %v2667_v28 = vpop.f32.mrb[16].mxu0  ;;  %v1273_v21 = vmul.f32 %v3646_v11, %v4296_v63 }
 0x390   :  { %v1300_v6 = vsub.f32 %v2667_v28, %v1268_v48  ;;  %v1036_v23 = vpop.f32.mrb[17].mxu0  ;;  %v1426_v38 = vmul.f32 %v3685_v17, %v3685_v17  ;;  %v1243_v48 = vld [vmem:[#allocation7 + $0xe8] sm:$0xff] }
 0x391   :  { %v1425_v16 = vmul.f32 %v3688_v24, %v3688_v24  ;;  %v1455_v29 = vadd.f32 %v1454_v13, %v1424_v31  ;;  %v1299_v18 = vsub.f32 %v1036_v23, %v1267_v32  ;;  %v4297_v23 = vld [vmem:[#allocation25_spill] sm:$0xff] }
 0x392   :  { %v3699_v37 = vadd.f32 %v1300_v6, %v3368_v44 }
 0x393   :  { %v1456_v33 = vadd.f32 %v1455_v29, %v1425_v16  ;;  %v3702_v34 = vadd.f32 %v1299_v18, %v3366_v43  ;;  %v2670_v40 = vpop.f32.mrb[18].mxu0  ;;  %v1276_v16 = vmul.f32 %v3646_v11, %v4297_v23  ;;  %v1275_v29 = vmul.f32 %v1243_v48, %v3646_v11 }
 0x394   :  { %v1302_v36 = vsub.f32 %v2670_v40, %v1270_v3  ;;  %v1046_v5 = vpop.f32.mrb[19].mxu0  ;;  %v1428_v44 = vmul.f32 %v3699_v37, %v3699_v37 }
 0x395   :  { %v1427_v8 = vmul.f32 %v3702_v34, %v3702_v34  ;;  %v1457_v14 = vadd.f32 %v1456_v33, %v1426_v38  ;;  %v1301_v7 = vsub.f32 %v1046_v5, %v1269_v26  ;;  %v1246_v38 = vld [vmem:[#allocation7 + $0x118] sm:$0xff]  ;;  %v1245_v33 = vld [vmem:[#allocation7 + $0x108] sm:$0xff] }
 0x396   :  { %v3713_v43 = vadd.f32 %v1302_v36, %v3374_v50 }
 0x397   :  { %v1458_v59 = vadd.f32 %v1457_v14, %v1427_v8  ;;  %v3716_v2 = vadd.f32 %v1301_v7, %v3372_v49  ;;  %v2673_v45 = vpop.f32.mrb[20].mxu0  ;;  %v1278_v7 = vmul.f32 %v1246_v38, %v3646_v11 }
 0x398   :  { %v1304_v54 = vsub.f32 %v2673_v45, %v1272_v1  ;;  %v1056_v9 = vpop.f32.mrb[21].mxu0  ;;  %v1430_v50 = vmul.f32 %v3713_v43, %v3713_v43  ;;  %v1277_v1 = vmul.f32 %v1245_v33, %v3646_v11 }
 0x399   :  { %v1429_v4 = vmul.f32 %v3716_v2, %v3716_v2  ;;  %v1459_v27 = vadd.f32 %v1458_v59, %v1428_v44  ;;  %v1303_v61 = vsub.f32 %v1056_v9, %v1271_v53  ;;  %v1248_v9 = vld [vmem:[#allocation7 + $0x138] sm:$0xff] }
 0x39a   :  { %v3727_v49 = vadd.f32 %v1304_v54, %v3380_v56 }
 0x39b   :  { %v1460_v60 = vadd.f32 %v1459_v27, %v1429_v4  ;;  %v3730_v15 = vadd.f32 %v1303_v61, %v3378_v55  ;;  %v2676_v58 = vpop.f32.mrb[22].mxu0  ;;  %v1247_v61 = vld [vmem:[#allocation7 + $0x128] sm:$0xff] }
 0x39c   :  { %v1306_v32 = vsub.f32 %v2676_v58, %v1274_v62  ;;  %v1066_v31 = vpop.f32.mrb[23].mxu0  ;;  %v1432_v56 = vmul.f32 %v3727_v49, %v3727_v49 }
 0x39d   :  { %v1431_v13 = vmul.f32 %v3730_v15, %v3730_v15  ;;  %v1461_v28 = vadd.f32 %v1460_v60, %v1430_v50  ;;  %v1305_v6 = vsub.f32 %v1066_v31, %v1273_v21  ;;  %v1280_v21 = vmul.f32 %v1248_v9, %v3646_v11 }
 0x39e   :  { %v3740_v55 = vadd.f32 %v1306_v32, %v4295_v57  ;;  %v1279_v32 = vmul.f32 %v1247_v61, %v3646_v11 }
 0x39f   :  { %v1462_v18 = vadd.f32 %v1461_v28, %v1431_v13  ;;  %v3743_v3 = vadd.f32 %v1305_v6, %v4296_v63  ;;  %v2679_v26 = vpop.f32.mrb[24].mxu0 }
 0x3a0   :  { %v1308_v40 = vsub.f32 %v2679_v26, %v1276_v16  ;;  %v1076_v36 = vpop.f32.mrb[25].mxu0  ;;  %v1434_v53 = vmul.f32 %v3740_v55, %v3740_v55 }
 0x3a1   :  { %v1433_v5 = vmul.f32 %v3743_v3, %v3743_v3  ;;  %v1463_v8 = vadd.f32 %v1462_v18, %v1432_v56  ;;  %v1307_v14 = vsub.f32 %v1076_v36, %v1275_v29  ;;  %v1250_v29 = vld [vmem:[#allocation7 + $0x158] sm:$0xff]  ;;  %v1249_v56 = vld [vmem:[#allocation7 + $0x148] sm:$0xff] }
 0x3a2   :  { %v3752_v59 = vadd.f32 %v1308_v40, %v4297_v23 }
 0x3a3   :  { %v1464_v44 = vadd.f32 %v1463_v8, %v1433_v5  ;;  %v3754_v45 = vadd.f32 %v1307_v14, %v1243_v48  ;;  %v2682_v54 = vpop.f32.mrb[26].mxu0  ;;  %v1281_v5 = vmul.f32 %v1249_v56, %v3646_v11 }
 0x3a4   :  { %v1310_v4 = vsub.f32 %v2682_v54, %v1278_v7  ;;  %v1086_v27 = vpop.f32.mrb[27].mxu0  ;;  %v1436_v50 = vmul.f32 %v3752_v59, %v3752_v59  ;;  %v1252_v54 = vld [vmem:[#allocation7 + $0x178] sm:$0xff] }
 0x3a5   :  { %v1435_v57 = vmul.f32 %v3754_v45, %v3754_v45  ;;  %v1465_v62 = vadd.f32 %v1464_v44, %v1434_v53  ;;  %v1309_v63 = vsub.f32 %v1086_v27, %v1277_v1 }
 0x3a6   :  { %v3764_v28 = vadd.f32 %v1310_v4, %v1246_v38  ;;  %v1251_v4 = vld [vmem:[#allocation7 + $0x168] sm:$0xff] }
 0x3a7   :  { %v1466_v60 = vadd.f32 %v1465_v62, %v1435_v57  ;;  %v3761_v58 = vadd.f32 %v1309_v63, %v1245_v33  ;;  %v2685_v48 = vpop.f32.mrb[28].mxu0  ;;  %v1282_v33 = vmul.f32 %v1250_v29, %v3646_v11 }
 0x3a8   :  { %v1312_v31 = vsub.f32 %v2685_v48, %v1280_v21  ;;  %v1096_v13 = vpop.f32.mrb[29].mxu0  ;;  %v1438_v40 = vmul.f32 %v3764_v28, %v3764_v28  ;;  %v1283_v21 = vmul.f32 %v1251_v4, %v3646_v11 }
 0x3a9   :  { %v1437_v6 = vmul.f32 %v3761_v58, %v3761_v58  ;;  %v1467_v23 = vadd.f32 %v1466_v60, %v1436_v50  ;;  %v1311_v16 = vsub.f32 %v1096_v13, %v1279_v32 }
 0x3aa   :  { %v3776_v53 = vadd.f32 %v1312_v31, %v1248_v9 }
 0x3ab   :  { %v1468_v18 = vadd.f32 %v1467_v23, %v1437_v6  ;;  %v3768_v26 = vadd.f32 %v1311_v16, %v1247_v61  ;;  %v1284_v61 = vmul.f32 %v1252_v54, %v3646_v11  ;;  %v1254_v6 = vld [vmem:[#allocation7 + $0x198] sm:$0xff]  ;;  %v1253_v23 = vld [vmem:[#allocation7 + $0x188] sm:$0xff] }
 0x3ac   :  { %v1440_v57 = vmul.f32 %v3776_v53, %v3776_v53 }
 0x3ad   :  { %v2688_v36 = vpop.f32.mrb[30].mxu0  ;;  %v1439_v14 = vmul.f32 %v3768_v26, %v3768_v26  ;;  %v1469_v7 = vadd.f32 %v1468_v18, %v1438_v40  ;;  %v1286_v18 = vmul.f32 %v1254_v6, %v3646_v11 }
 0x3ae   :  { %v1314_v38 = vsub.f32 %v2688_v36, %v1282_v33  ;;  %v1106_v8 = vpop.f32.mrb[31].mxu0  ;;  %v1285_v36 = vmul.f32 %v1253_v23, %v3646_v11 }
 0x3af   :  { %v1313_v1 = vsub.f32 %v1106_v8, %v1281_v5  ;;  %v1470_v27 = vadd.f32 %v1469_v7, %v1439_v14 }
 0x3b0   :  { %v3786_v9 = vadd.f32 %v1314_v38, %v1250_v29 }
 0x3b1   :  { %v3778_v44 = vadd.f32 %v1313_v1, %v1249_v56  ;;  %v1471_v48 = vadd.f32 %v1470_v27, %v1440_v57  ;;  %v1256_v27 = vld [vmem:[#allocation7 + $0x1b8] sm:$0xff] }
 0x3b2   :  { %v1442_v16 = vmul.f32 %v3786_v9, %v3786_v9 }
 0x3b3   :  { %v1441_v62 = vmul.f32 %v3778_v44, %v3778_v44 }
 0x3b5   :  { %v2691_v63 = vpop.f32.mrb[32].mxu0  ;;  %v1472_v31 = vadd.f32 %v1471_v48, %v1441_v62  ;;  %v1288_v62 = vmul.f32 %v1256_v27, %v3646_v11 }
 0x3b6   :  { %v1316_v50 = vsub.f32 %v2691_v63, %v1284_v61  ;;  %v1116_v60 = vpop.f32.mrb[33].mxu0  ;;  %v1255_v61 = vld [vmem:[#allocation7 + $0x1a8] sm:$0xff] }
 0x3b7   :  { %v1315_v32 = vsub.f32 %v1116_v60, %v1283_v21  ;;  %v1473_v40 = vadd.f32 %v1472_v31, %v1442_v16  ;;  %v1287_v60 = vmul.f32 %v1255_v61, %v3646_v11 }
 0x3b8   :  { %v3795_v33 = vadd.f32 %v1316_v50, %v1252_v54 }
 0x3b9   :  { %v3788_v13 = vadd.f32 %v1315_v32, %v1251_v4 }
 0x3ba   :  { %v1444_v7 = vmul.f32 %v3795_v33, %v3795_v33 }
 0x3bb   :  { %v1443_v56 = vmul.f32 %v3788_v13, %v3788_v13 }
 0x3bd   :  { %v2694_v29 = vpop.f32.mrb[34].mxu0  ;;  %v1474_v8 = vadd.f32 %v1473_v40, %v1443_v56  ;;  %v1258_v56 = vld [vmem:[#allocation7 + $0x1d8] sm:$0xff] }
 0x3be   :  { %v1318_v5 = vsub.f32 %v2694_v29, %v1286_v18  ;;  %v1126_v38 = vpop.f32.mrb[35].mxu0  ;;  %v1257_v18 = vld [vmem:[#allocation7 + $0x1c8] sm:$0xff]  ;;  %v1290_v29 = vmul.f32 %v1258_v56, %v3646_v11 }
 0x3bf   :  { %v1317_v14 = vsub.f32 %v1126_v38, %v1285_v36  ;;  %v1475_v57 = vadd.f32 %v1474_v8, %v1444_v7  ;;  %v1289_v8 = vmul.f32 %v1257_v18, %v3646_v11 }
 0x3c0   :  { %v3800_v1 = vadd.f32 %v1318_v5, %v1254_v6 }
 0x3c1   :  { %v3802_v4 = vadd.f32 %v1317_v14, %v1253_v23 }
 0x3c2   :  { %v1446_v63 = vmul.f32 %v3800_v1, %v3800_v1 }
 0x3c3   :  { %v1445_v54 = vmul.f32 %v3802_v4, %v3802_v4 }
 0x3c5   :  { %v1476_v21 = vadd.f32 %v1475_v57, %v1445_v54  ;;  %v2697_v50 = vpop.f32.mrb[36].mxu0 }
 0x3c6   :  { %v1320_v48 = vsub.f32 %v2697_v50, %v1288_v62  ;;  %v1136_v32 = vpop.f32.mrb[37].mxu0  ;;  %v1260_v62 = vld [vmem:[#allocation7 + $0x1f8] sm:$0xff] }
 0x3c7   :  { %v1319_v31 = vsub.f32 %v1136_v32, %v1287_v60  ;;  %v1477_v6 = vadd.f32 %v1476_v21, %v1446_v63  ;;  %v1259_v63 = vld [vmem:[#allocation7 + $0x1e8] sm:$0xff]  ;;  %v1292_v50 = vmul.f32 %v1260_v62, %v3646_v11 }
 0x3c8   :  { %v3810_v23 = vadd.f32 %v1320_v48, %v1256_v27 }
 0x3c9   :  { %v3812_v16 = vadd.f32 %v1319_v31, %v1255_v61  ;;  %v1291_v31 = vmul.f32 %v1259_v63, %v3646_v11 }
 0x3ca   :  { %v1448_v36 = vmul.f32 %v3810_v23, %v3810_v23 }
 0x3cb   :  { %v1447_v40 = vmul.f32 %v3812_v16, %v3812_v16 }
 0x3cd   :  { %v1478_v5 = vadd.f32 %v1477_v6, %v1447_v40  ;;  %v2700_v38 = vpop.f32.mrb[38].mxu0 }
 0x3ce   :  { %v1322_v14 = vsub.f32 %v2700_v38, %v1290_v29  ;;  %v1146_v7 = vpop.f32.mrb[39].mxu0 }
 0x3cf   :  { %v1321_v27 = vsub.f32 %v1146_v7, %v1289_v8  ;;  %v1479_v54 = vadd.f32 %v1478_v5, %v1448_v36 }
 0x3d0   :  { %v3820_v61 = vadd.f32 %v1322_v14, %v1258_v56 }
 0x3d1   :  { %v3822_v57 = vadd.f32 %v1321_v27, %v1257_v18  ;;  %v2559_v18 = vld [vmem:[%s4267_s6] ss:$0 sm:$0xff] }
 0x3d2   :  { %v1450_v60 = vmul.f32 %v3820_v61, %v3820_v61 }
 0x3d3   :  { %v1449_v21 = vmul.f32 %v3822_v57, %v3822_v57 }
 0x3d5   :  { %v1480_v48 = vadd.f32 %v1479_v54, %v1449_v21  ;;  %v2703_v32 = vpop.f32.mrb[40].mxu0 }
 0x3d6   :  { %v1324_v6 = vsub.f32 %v2703_v32, %v1292_v50  ;;  %v1156_v40 = vpop.f32.mrb[41].mxu0 }
 0x3d7   :  { %v1323_v56 = vsub.f32 %v1156_v40, %v1291_v31  ;;  %v1481_v29 = vadd.f32 %v1480_v48, %v1450_v60 }
 0x3d8   :  { %v3833_v36 = vadd.f32 %v1324_v6, %v1260_v62 }
 0x3d9   :  { %v1355_v5 = vadd.f32 %v1323_v56, %v1259_v63  ;;  %v3835_v38 = vpop.f32.mrb[42].mxu0 }
 0x3da   :  { %v1704_v8 = vadd.f32 %v2559_v18, %v3835_v38  ;;  %1707 = vrot.lane.b32.xlu1 %v3835_v38, %s3166_s5  ;;  %v2738_v11 = vpop.f32.mrb[43].mxu0  ;;  %v1452_v27 = vmul.f32 %v3833_v36, %v3833_v36 }
 0x3db   :  { %v1451_v14 = vmul.f32 %v1355_v5, %v1355_v5 }
 0x3dc   :  { %v1705_v7 = vmax.f32 %v1704_v8, 0.0 }
 0x3dd   :  { %v1482_v54 = vadd.f32 %v1481_v29, %v1451_v14 }
 0x3de   :  { %2782 = vmatmul.mubr.msk.f32.vlgmr.msra.gmra.mrb[44].mxu0 %vm1710_vm2, %v1705_v7 }
 0x3df   :  { %v1483_v62 = vadd.f32 %v1482_v54, %v1452_v27 }
 0x3e1   :  { %v1484_v21 = vrot.slane %v1483_v62, 4 }
 0x3e3   :  { %v1485_v63 = vadd.f32 %v1484_v21, %v1483_v62 }
 0x3e5   :  { %v1486_v50 = vrot.slane %v1485_v63, 2 }
 0x3e7   :  { %v1487_v60 = vadd.f32 %v1486_v50, %v1485_v63 }
 0x3e9   :  { %v1488_v48 = vrot.slane %v1487_v60, 1 }
 0x3eb   :  { %v1489_v32 = vadd.f32 %v1488_v48, %v1487_v60 }
 0x3ed   :  { %2928 = vrsqrt.f32 %v1489_v32  ;;  %vm1492_vm8 = vcmp.eq.f32.partialorder %v1489_v32, inf  ;;  %v1495_v40 = vand.u32 2147483648, %v1489_v32  ;;  %vm1494_vm9 = vcmp.eq.f32.partialorder %v1489_v32, 0.0 }
 0x3f7   :  { %v2929_v31 = vpop.eup %2928 }
 0x3f8   :  { %v1491_v6 = vmul.f32 %v2929_v31, %v1489_v32 }
 0x3fa   :  { %v1493_v56 = vsel %vm1492_vm8, %v1489_v32, %v1491_v6 }
 0x3fb   :  { %v1496_v18 = vsel %vm1494_vm9, %v1495_v40, %v1493_v56 }
 0x3fc   :  { %2930 = vrcp.f32 %v1496_v18 }
 0x406   :  { %v2931_v8 = vpop.eup %2930 }
 0x407   :  { %v3843_v29 = vmul.f32 %v2931_v8, %v1355_v5  ;;  %v1498_v11 = vmul.f32 %v2931_v8, %v3658_v12  ;;  %v1499_v14 = vmul.f32 %v2931_v8, %v3653_v30  ;;  %v1500_v7 = vmul.f32 %v2931_v8, %v3672_v25 }
 0x408   :  { %v1501_v27 = vmul.f32 %v2931_v8, %v3669_v20  ;;  %v1502_v54 = vmul.f32 %v2931_v8, %v3688_v24  ;;  %v1503_v62 = vmul.f32 %v2931_v8, %v3685_v17  ;;  %v1504_v21 = vmul.f32 %v2931_v8, %v3702_v34 }
 0x409   :  { %1560 = vst [vmem:[#allocation14 + $0x1e8] sm:$0xff] %v3843_v29  ;;  %v1505_v63 = vmul.f32 %v2931_v8, %v3699_v37  ;;  %v1506_v5 = vmul.f32 %v2931_v8, %v3716_v2  ;;  %v1507_v12 = vmul.f32 %v2931_v8, %v3713_v43  ;;  %v1508_v30 = vmul.f32 %v2931_v8, %v3730_v15 }
 0x40a   :  { %1530 = vst [vmem:[#allocation14 + $0x8] sm:$0xff] %v1498_v11  ;;  %1531 = vst [vmem:[#allocation14 + $0x18] sm:$0xff] %v1499_v14  ;;  %v1509_v20 = vmul.f32 %v2931_v8, %v3727_v49  ;;  %v1510_v25 = vmul.f32 %v2931_v8, %v3743_v3  ;;  %v1511_v17 = vmul.f32 %v2931_v8, %v3740_v55 }
 0x40b   :  { %1532 = vst [vmem:[#allocation14 + $0x28] sm:$0xff] %v1500_v7  ;;  %v1512_v24 = vmul.f32 %v2931_v8, %v3754_v45  ;;  %1533 = vst [vmem:[#allocation14 + $0x38] sm:$0xff] %v1501_v27  ;;  %v1513_v37 = vmul.f32 %v2931_v8, %v3752_v59  ;;  %v1514_v34 = vmul.f32 %v2931_v8, %v3761_v58 }
 0x40c   :  { %1534 = vst [vmem:[#allocation14 + $0x48] sm:$0xff] %v1502_v54  ;;  %1535 = vst [vmem:[#allocation14 + $0x58] sm:$0xff] %v1503_v62  ;;  %v1515_v43 = vmul.f32 %v2931_v8, %v3764_v28  ;;  %v1516_v2 = vmul.f32 %v2931_v8, %v3768_v26  ;;  %v1517_v49 = vmul.f32 %v2931_v8, %v3776_v53 }
 0x40d   :  { %1536 = vst [vmem:[#allocation14 + $0x68] sm:$0xff] %v1504_v21  ;;  %1537 = vst [vmem:[#allocation14 + $0x78] sm:$0xff] %v1505_v63  ;;  %v1518_v15 = vmul.f32 %v2931_v8, %v3778_v44  ;;  %v1519_v55 = vmul.f32 %v2931_v8, %v3786_v9  ;;  %v1520_v3 = vmul.f32 %v2931_v8, %v3788_v13 }
 0x40e   :  { %1538 = vst [vmem:[#allocation14 + $0x88] sm:$0xff] %v1506_v5  ;;  %1539 = vst [vmem:[#allocation14 + $0x98] sm:$0xff] %v1507_v12  ;;  %v1521_v59 = vmul.f32 %v2931_v8, %v3795_v33  ;;  %v1522_v45 = vmul.f32 %v2931_v8, %v3802_v4  ;;  %v1523_v58 = vmul.f32 %v2931_v8, %v3800_v1 }
 0x40f   :  { %1540 = vst [vmem:[#allocation14 + $0xa8] sm:$0xff] %v1508_v30  ;;  %1541 = vst [vmem:[#allocation14 + $0xb8] sm:$0xff] %v1509_v20  ;;  %v1524_v28 = vmul.f32 %v2931_v8, %v3812_v16  ;;  %v1525_v26 = vmul.f32 %v2931_v8, %v3810_v23  ;;  %v1526_v53 = vmul.f32 %v2931_v8, %v3822_v57 }
 0x410   :  { %1542 = vst [vmem:[#allocation14 + $0xc8] sm:$0xff] %v1510_v25  ;;  %1543 = vst [vmem:[#allocation14 + $0xd8] sm:$0xff] %v1511_v17  ;;  %v1527_v44 = vmul.f32 %v2931_v8, %v3820_v61  ;;  %v1529_v9 = vmul.f32 %v2931_v8, %v3833_v36  ;;  %v1562_v13 = vadd.f32 %v1499_v14, %v1498_v11 }
 0x411   :  { %1544 = vst [vmem:[#allocation14 + $0xe8] sm:$0xff] %v1512_v24  ;;  %1545 = vst [vmem:[#allocation14 + $0xf8] sm:$0xff] %v1513_v37 }
 0x412   :  { %1546 = vst [vmem:[#allocation14 + $0x108] sm:$0xff] %v1514_v34  ;;  %1547 = vst [vmem:[#allocation14 + $0x118] sm:$0xff] %v1515_v43  ;;  %v1563_v33 = vadd.f32 %v1562_v13, %v1500_v7  ;;  %v3888_v13 = vld [vmem:[#allocation8 + $0x8] sm:$0xff] }
 0x413   :  { %1548 = vst [vmem:[#allocation14 + $0x128] sm:$0xff] %v1516_v2  ;;  %1549 = vst [vmem:[#allocation14 + $0x138] sm:$0xff] %v1517_v49 }
 0x414   :  { %1550 = vst [vmem:[#allocation14 + $0x148] sm:$0xff] %v1518_v15  ;;  %1551 = vst [vmem:[#allocation14 + $0x158] sm:$0xff] %v1519_v55  ;;  %v1564_v1 = vadd.f32 %v1563_v33, %v1501_v27 }
 0x415   :  { %1552 = vst [vmem:[#allocation14 + $0x168] sm:$0xff] %v1520_v3  ;;  %1553 = vst [vmem:[#allocation14 + $0x178] sm:$0xff] %v1521_v59 }
 0x416   :  { %1554 = vst [vmem:[#allocation14 + $0x188] sm:$0xff] %v1522_v45  ;;  %1555 = vst [vmem:[#allocation14 + $0x198] sm:$0xff] %v1523_v58  ;;  %v1565_v4 = vadd.f32 %v1564_v1, %v1502_v54 }
 0x417   :  { %1556 = vst [vmem:[#allocation14 + $0x1a8] sm:$0xff] %v1524_v28  ;;  %1557 = vst [vmem:[#allocation14 + $0x1b8] sm:$0xff] %v1525_v26 }
 0x418   :  { %1558 = vst [vmem:[#allocation14 + $0x1c8] sm:$0xff] %v1526_v53  ;;  %1559 = vst [vmem:[#allocation14 + $0x1d8] sm:$0xff] %v1527_v44  ;;  %v1566_v23 = vadd.f32 %v1565_v4, %v1503_v62  ;;  %v3891_v4 = vld [vmem:[#allocation8 + $0x10] sm:$0xff] }
 0x419   :  { %1561 = vst [vmem:[#allocation14 + $0x1f8] sm:$0xff] %v1529_v9 }
 0x41a   :  { %v1567_v16 = vadd.f32 %v1566_v23, %v1504_v21  ;;  %v3895_v23 = vld [vmem:[#allocation8 + $0x18] sm:$0xff] }
 0x41c   :  { %v1568_v61 = vadd.f32 %v1567_v16, %v1505_v63 }
 0x41e   :  { %v1569_v57 = vadd.f32 %v1568_v61, %v1506_v5  ;;  %v3899_v61 = vld [vmem:[#allocation8 + $0x20] sm:$0xff] }
 0x420   :  { %v1570_v36 = vadd.f32 %v1569_v57, %v1507_v12 }
 0x422   :  { %v1571_v50 = vadd.f32 %v1570_v36, %v1508_v30  ;;  %v3903_v36 = vld [vmem:[#allocation8 + $0x28] sm:$0xff] }
 0x424   :  { %v1572_v60 = vadd.f32 %v1571_v50, %v1509_v20 }
 0x426   :  { %v1573_v48 = vadd.f32 %v1572_v60, %v1510_v25  ;;  %v3907_v60 = vld [vmem:[#allocation8 + $0x30] sm:$0xff] }
 0x428   :  { %v1574_v32 = vadd.f32 %v1573_v48, %v1511_v17 }
 0x42a   :  { %v1575_v31 = vadd.f32 %v1574_v32, %v1512_v24  ;;  %v2576_v24 = vld [vmem:[%s4269_s8] ss:$0 sm:$0xff]  ;;  %s3168_s8 = smov [#allocation12]  }
 0x42b   :  { %v3911_v32 = vld [vmem:[#allocation8 + $0x38] sm:$0xff]  ;;  %s2467_s16 = sshll.u32 %s3168_s8, 4  ;;  %s4140_s16 = int_to_ptr.vmem [resolvable:$true] %s2467_s16 }
 0x42c   :  { %v1576_v6 = vadd.f32 %v1575_v31, %v1513_v37  ;;  %s3052_s22 = scalar_lea.vmem %s4140_s16, 2048  ;;  %p3057_p13 = scmp.lt.s32.totalorder %s4140_s16, %s4140_s16 }
 0x42d   :  { %p3053_p12 = scmp.ne.s32.totalorder %s4140_s16, %s3052_s22  ;;  %p3058_p0 = scmp.lt.s32.totalorder %s3052_s22, %s3052_s22 }
 0x42e   :  { %v1577_v40 = vadd.f32 %v1576_v6, %v1514_v34 }
 0x42f   :  { %p3059_p1 = por %p3058_p0, %p3057_p13 }
 0x430   :  { %v1578_v56 = vadd.f32 %v1577_v40, %v1515_v43  ;;  %v3919_v40 = vld [vmem:[#allocation8 + $0x48] sm:$0xff] }
 0x431   :  { %p3060_p2 = pnand %p3059_p1, %p3053_p12 }
 0x432   :  { %v1579_v18 = vadd.f32 %v1578_v56, %v1516_v2 }
 0x434   :  { %v1580_v8 = vadd.f32 %v1579_v18, %v1517_v49 }
 0x436   :  { %v1581_v11 = vadd.f32 %v1580_v8, %v1518_v15 }
 0x438   :  { %v1582_v14 = vadd.f32 %v1581_v11, %v1519_v55 }
 0x43a   :  { %v1583_v7 = vadd.f32 %v1582_v14, %v1520_v3 }
 0x43c   :  { %v1584_v27 = vadd.f32 %v1583_v7, %v1521_v59 }
 0x43e   :  { %v1585_v54 = vadd.f32 %v1584_v27, %v1522_v45  ;;  %v3936_v27 = vld [vmem:[#allocation8] sm:$0xff] }
 0x440   :  { %v1586_v62 = vadd.f32 %v1585_v54, %v1523_v58 }
 0x442   :  { %v1587_v21 = vadd.f32 %v1586_v62, %v1524_v28 }
 0x444   :  { %v1588_v63 = vadd.f32 %v1587_v21, %v1525_v26 }
 0x446   :  { %v1589_v5 = vadd.f32 %v1588_v63, %v1526_v53 }
 0x448   :  { %v1590_v12 = vadd.f32 %v1589_v5, %v1527_v44 }
 0x44a   :  { %v1591_v30 = vadd.f32 %v1590_v12, %v3843_v29 }
 0x44c   :  { %v3878_v20 = vadd.f32 %v1591_v30, %v1529_v9  ;;  %v1708_v25 = vpop.permute.xlu1 %1707 }
 0x44d   :  { %v1711_v17 = vsel %vm1710_vm2, %v1708_v25, 0.0 }
 0x44e   :  { %1712 = vadd.xlane.f32.xlu0 %v1711_v17 }
 0x4b1   :  { %v2446_v37 = vpop.f32.mrb[44].mxu0 }
 0x4b2   :  { %v2447_v34 = vadd.f32 %v2576_v24, %v2446_v37  ;;  %v2783_v43 = vpop.f32.mrb[45].mxu0 }
 0x4b4   :  { %v2450_v2 = vmax.f32 %v2447_v34, 0.0 }
 0x4b6   :  { %2451 = vst [vmem:[#allocation11] sm:$0xff] %v2450_v2 }
 0x4db   :  { %v1713_v49 = vpop.xlane.xlu0 %1712 }
 0x4dc   :  { %v1714_v15 = vsub.f32 %v1713_v49, %v3835_v38 }
 0x4de   :  { %v1715_v55 = vmul.f32 0.01, %v1714_v15 }
 0x4e0   :  { %v1716_v29 = vsub.f32 %v3835_v38, %v1715_v55 }
 0x4e2   :  { %v1717_v3 = vmax.f32 %v1716_v29, 0.0 }
 0x4e4   :  { %v1718_v59 = vmul.f32 %v1717_v3, %v1717_v3  ;;  %1761 = vrot.lane.b32.xlu1 %v1717_v3, %s3166_s5 }
 0x4e6   :  { %v1720_v45 = vsel %vm1719_vm10, %v1718_v59, 0.0 }
 0x4e7   :  { %v1721_v58 = vrot.slane %v1720_v45, 4 }
 0x4e9   :  { %v1722_v28 = vadd.f32 %v1721_v58, %v1720_v45 }
 0x4eb   :  { %v1723_v26 = vrot.slane %v1722_v28, 2 }
 0x4ed   :  { %v1724_v53 = vadd.f32 %v1723_v26, %v1722_v28 }
 0x4ef   :  { %v1725_v44 = vrot.slane %v1724_v53, 1 }
 0x4f1   :  { %v1726_v9 = vadd.f32 %v1725_v44, %v1724_v53 }
 0x4f3   :  { %v1727_v33 = vmul.f32 0.125, %v1726_v9 }
 0x4f5   :  { %v1990_v1 = vmul.f32 %v3888_v13, %v1727_v33  ;;  %v1991_v38 = vmul.f32 %v3891_v4, %v1727_v33  ;;  %v1992_v16 = vmul.f32 %v3895_v23, %v1727_v33  ;;  %v1993_v57 = vmul.f32 %v3899_v61, %v1727_v33 }
 0x4f6   :  { %v1994_v50 = vmul.f32 %v3903_v36, %v1727_v33  ;;  %v1995_v48 = vmul.f32 %v3907_v60, %v1727_v33  ;;  %v1996_v31 = vmul.f32 %v3911_v32, %v1727_v33  ;;  %v1997_v6 = vmul.f32 %v1727_v33, %v3454_v39 }
 0x4f7   :  { %2023 = vrot.lane.b32.xlu0 %v1990_v1, %s3166_s5  ;;  %v1998_v56 = vmul.f32 %v3919_v40, %v1727_v33  ;;  %v1999_v18 = vmul.f32 %v1727_v33, %v3462_v41  ;;  %v2000_v22 = vmul.f32 %v1727_v33, %v3464_v42  ;;  %v2002_v8 = vmul.f32 %v1727_v33, %v3472_v47 }
 0x4f8   :  { %v2003_v11 = vmul.f32 %v1727_v33, %v3478_v51  ;;  %v2004_v14 = vmul.f32 %v1727_v33, %v3480_v52  ;;  %v1989_v54 = vmul.f32 %v3936_v27, %v1727_v33 }
 0x4fb   :  { %2025 = vrot.lane.b32.xlu0 %v1991_v38, %s3166_s5 }
 0x4ff   :  { %2027 = vrot.lane.b32.xlu0 %v1992_v16, %s3166_s5 }
 0x503   :  { %2029 = vrot.lane.b32.xlu0 %v1993_v57, %s3166_s5 }
 0x507   :  { %2031 = vrot.lane.b32.xlu0 %v1994_v50, %s3166_s5 }
 0x50b   :  { %2033 = vrot.lane.b32.xlu0 %v1995_v48, %s3166_s5 }
 0x50d   :  { %1728 = vxpose.xlu1.b32.start.end [1/1] (short) %v765_v10, 128  ;;  %v2001_v10 = vmul.f32 %v1727_v33, %v3470_v46 }
 0x50f   :  { %2035 = vrot.lane.b32.xlu0 %v1996_v31, %s3166_s5 }
 0x513   :  { %2037 = vrot.lane.b32.xlu0 %v1997_v6, %s3166_s5 }
 0x517   :  { %2039 = vrot.lane.b32.xlu0 %v1998_v56, %s3166_s5 }
 0x51b   :  { %2041 = vrot.lane.b32.xlu0 %v1999_v18, %s3166_s5 }
 0x51f   :  { %2043 = vrot.lane.b32.xlu0 %v2000_v22, %s3166_s5 }
 0x523   :  { %2045 = vrot.lane.b32.xlu0 %v2001_v10, %s3166_s5 }
 0x527   :  { %2047 = vrot.lane.b32.xlu0 %v2002_v8, %s3166_s5 }
 0x52b   :  { %2049 = vrot.lane.b32.xlu0 %v2003_v11, %s3166_s5 }
 0x52f   :  { %2051 = vrot.lane.b32.xlu0 %v2004_v14, %s3166_s5 }
 0x556   :  { %v1762_v7 = vpop.permute.xlu1 %1761 }
 0x557   :  { %2739 = vmatprep.subr.mxu1 %v1762_v7 }
 0x558   :  { %2740 = vmatpush3.msra.mxu1 %v1762_v7 }
 0x567   :  { %2021 = vrot.lane.b32.xlu1 %v1989_v54, %s3166_s5 }
 0x569   :  { %v2024_v29 = vpop.permute.xlu0 %2023 }
 0x56d   :  { %v2026_v3 = vpop.permute.xlu0 %2025 }
 0x571   :  { %v2028_v59 = vpop.permute.xlu0 %2027 }
 0x575   :  { %v2030_v45 = vpop.permute.xlu0 %2029 }
 0x579   :  { %v2032_v58 = vpop.permute.xlu0 %2031 }
 0x57d   :  { %v2034_v44 = vpop.permute.xlu0 %2033 }
 0x581   :  { %v2036_v1 = vpop.permute.xlu0 %2035 }
 0x585   :  { %v2038_v48 = vpop.permute.xlu0 %2037 }
 0x589   :  { %v2040_v22 = vpop.permute.xlu0 %2039 }
 0x58d   :  { %v1744_v62 = vpop.trf.xlu1  ;;  %v2042_v14 = vpop.permute.xlu0 %2041 }
 0x58e   :  { %2741 = vmatprep.mubr.msk.f32.mxu1 %vm344_vm1, %v1744_v62 }
 0x591   :  { %v1745_v21 = vpop.trf.xlu1  ;;  %v2044_v54 = vpop.permute.xlu0 %2043 }
 0x592   :  { %2742 = vmatmul.mubr.msk.f32.vlgmr.msra.gmra.mrb[4].mxu1 %vm344_vm1, %v1745_v21 }
 0x595   :  { %v1746_v63 = vpop.trf.xlu1 }
 0x596   :  { %2744 = vmatprep.mubr.msk.f32.mxu1 %vm344_vm1, %v1746_v63 }
 0x599   :  { %v1747_v5 = vpop.trf.xlu1 }
 0x59a   :  { %2745 = vmatmul.mubr.msk.f32.gmra.mrb[6].mxu1 %vm344_vm1, %v1747_v5 }
 0x59d   :  { %v1748_v12 = vpop.trf.xlu1 }
 0x59e   :  { %2747 = vmatprep.mubr.msk.f32.mxu1 %vm344_vm1, %v1748_v12  ;;  %v2046_v12 = vpop.permute.xlu0 %2045 }
 0x5a1   :  { %v1749_v30 = vpop.trf.xlu1 }
 0x5a2   :  { %2748 = vmatmul.mubr.msk.f32.gmra.mrb[8].mxu1 %vm344_vm1, %v1749_v30 }
 0x5a5   :  { %v1750_v25 = vpop.trf.xlu1 }
 0x5a6   :  { %2750 = vmatprep.mubr.msk.f32.mxu1 %vm344_vm1, %v1750_v25 }
 0x5a9   :  { %v1751_v17 = vpop.trf.xlu1 }
 0x5aa   :  { %2751 = vmatmul.mubr.msk.f32.gmra.mrb[10].mxu1 %vm344_vm1, %v1751_v17 }
 0x5ad   :  { %v1752_v24 = vpop.trf.xlu1 }
 0x5ae   :  { %2753 = vmatprep.mubr.msk.f32.mxu1 %vm344_vm1, %v1752_v24 }
 0x5b1   :  { %v1753_v37 = vpop.trf.xlu1 }
 0x5b2   :  { %2754 = vmatmul.mubr.msk.f32.gmra.mrb[12].mxu1 %vm344_vm1, %v1753_v37  ;;  %v2048_v37 = vpop.permute.xlu0 %2047 }
 0x5b5   :  { %v1754_v34 = vpop.trf.xlu1 }
 0x5b6   :  { %2756 = vmatprep.mubr.msk.f32.mxu1 %vm344_vm1, %v1754_v34 }
 0x5b9   :  { %v1755_v43 = vpop.trf.xlu1 }
 0x5ba   :  { %2757 = vmatmul.mubr.msk.f32.gmra.mrb[14].mxu1 %vm344_vm1, %v1755_v43 }
 0x5bd   :  { %v1756_v2 = vpop.trf.xlu1 }
 0x5be   :  { %2759 = vmatprep.mubr.msk.f32.mxu1 %vm344_vm1, %v1756_v2 }
 0x5c1   :  { %v1757_v49 = vpop.trf.xlu1 }
 0x5c2   :  { %2760 = vmatmul.mubr.msk.f32.gmra.mrb[16].mxu1 %vm344_vm1, %v1757_v49  ;;  %v2050_v49 = vpop.permute.xlu0 %2049 }
 0x5c5   :  { %v1758_v15 = vpop.trf.xlu1 }
 0x5c6   :  { %2762 = vmatprep.mubr.msk.f32.mxu1 %vm344_vm1, %v1758_v15 }
 0x5c9   :  { %v1759_v55 = vpop.trf.xlu1 }
 0x5ca   :  { %2763 = vmatmul.mubr.msk.f32.gmra.mrb[18].mxu1 %vm344_vm1, %v1759_v55  ;;  %v2052_v55 = vpop.permute.xlu0 %2051 }
 0x5d9   :  { %v2022_v9 = vpop.permute.xlu1 %2021 }
 0x665   :  { %v2743_v28 = vpop.f32.mrb[4].mxu1 }
 0x666   :  { %v2070_v26 = vsub.f32 %v2743_v28, %v2024_v29  ;;  %v1878_v53 = vpop.f32.mrb[5].mxu1 }
 0x667   :  { %v2069_v33 = vsub.f32 %v1878_v53, %v2022_v9 }
 0x668   :  { %2103 = vrot.lane.b32.xlu0 %v2070_v26, %s3166_s5 }
 0x66c   :  { %2101 = vrot.lane.b32.xlu0 %v2069_v33, %s3166_s5 }
 0x66d   :  { %v2746_v38 = vpop.f32.mrb[6].mxu1 }
 0x66e   :  { %v2072_v16 = vsub.f32 %v2746_v38, %v2028_v59  ;;  %v1888_v57 = vpop.f32.mrb[7].mxu1 }
 0x66f   :  { %v2071_v50 = vsub.f32 %v1888_v57, %v2026_v3 }
 0x670   :  { %2107 = vrot.lane.b32.xlu0 %v2072_v16, %s3166_s5 }
 0x671   :  { %2105 = vrot.lane.b32.xlu1 %v2071_v50, %s3166_s5 }
 0x675   :  { %v2749_v31 = vpop.f32.mrb[8].mxu1 }
 0x676   :  { %v2074_v6 = vsub.f32 %v2749_v31, %v2032_v58  ;;  %v1898_v56 = vpop.f32.mrb[9].mxu1 }
 0x677   :  { %v2073_v18 = vsub.f32 %v1898_v56, %v2030_v45 }
 0x678   :  { %2111 = vrot.lane.b32.xlu0 %v2074_v6, %s3166_s5 }
 0x679   :  { %2109 = vrot.lane.b32.xlu1 %v2073_v18, %s3166_s5 }
 0x67d   :  { %v2752_v10 = vpop.f32.mrb[10].mxu1 }
 0x67e   :  { %v2076_v8 = vsub.f32 %v2752_v10, %v2036_v1  ;;  %v1908_v11 = vpop.f32.mrb[11].mxu1 }
 0x67f   :  { %v2075_v7 = vsub.f32 %v1908_v11, %v2034_v44 }
 0x680   :  { %2115 = vrot.lane.b32.xlu0 %v2076_v8, %s3166_s5 }
 0x681   :  { %2113 = vrot.lane.b32.xlu1 %v2075_v7, %s3166_s5 }
 0x685   :  { %v2755_v62 = vpop.f32.mrb[12].mxu1 }
 0x686   :  { %v2078_v21 = vsub.f32 %v2755_v62, %v2040_v22  ;;  %v1918_v63 = vpop.f32.mrb[13].mxu1 }
 0x687   :  { %v2077_v5 = vsub.f32 %v1918_v63, %v2038_v48 }
 0x688   :  { %2119 = vrot.lane.b32.xlu0 %v2078_v21, %s3166_s5 }
 0x689   :  { %2117 = vrot.lane.b32.xlu1 %v2077_v5, %s3166_s5 }
 0x68d   :  { %v2758_v30 = vpop.f32.mrb[14].mxu1 }
 0x68e   :  { %v2080_v25 = vsub.f32 %v2758_v30, %v2044_v54  ;;  %v1928_v17 = vpop.f32.mrb[15].mxu1 }
 0x68f   :  { %v2079_v24 = vsub.f32 %v1928_v17, %v2042_v14 }
 0x690   :  { %2123 = vrot.lane.b32.xlu0 %v2080_v25, %s3166_s5 }
 0x691   :  { %2121 = vrot.lane.b32.xlu1 %v2079_v24, %s3166_s5 }
 0x695   :  { %v2761_v34 = vpop.f32.mrb[16].mxu1 }
 0x696   :  { %v2082_v43 = vsub.f32 %v2761_v34, %v2048_v37  ;;  %v1938_v2 = vpop.f32.mrb[17].mxu1 }
 0x697   :  { %v2081_v15 = vsub.f32 %v1938_v2, %v2046_v12 }
 0x698   :  { %2127 = vrot.lane.b32.xlu0 %v2082_v43, %s3166_s5 }
 0x699   :  { %2125 = vrot.lane.b32.xlu1 %v2081_v15, %s3166_s5 }
 0x69d   :  { %v2764_v29 = vpop.f32.mrb[18].mxu1 }
 0x69e   :  { %v2084_v3 = vsub.f32 %v2764_v29, %v2052_v55  ;;  %v1948_v59 = vpop.f32.mrb[19].mxu1 }
 0x69f   :  { %v2083_v45 = vsub.f32 %v1948_v59, %v2050_v49 }
 0x6a0   :  { %2131 = vrot.lane.b32.xlu0 %v2084_v3, %s3166_s5 }
 0x6a1   :  { %2129 = vrot.lane.b32.xlu1 %v2083_v45, %s3166_s5 }
 0x6da   :  { %v2104_v58 = vpop.permute.xlu0 %2103 }
 0x6db   :  { %v2150_v28 = vadd.f32 %v2104_v58, %v3888_v13 }
 0x6dd   :  { %2166 = vst.msk [vmem:[#allocation15 + $0x8] sm:$0xff] %vm1719_vm10, %v2150_v28 }
 0x6de   :  { %v2102_v26 = vpop.permute.xlu0 %2101 }
 0x6df   :  { %v2149_v53 = vadd.f32 %v2102_v26, %v3936_v27 }
 0x6e1   :  { %2165 = vst.msk [vmem:[#allocation15] sm:$0xff] %vm1719_vm10, %v2149_v53 }
 0x6e2   :  { %v2108_v44 = vpop.permute.xlu0 %2107 }
 0x6e3   :  { %v2152_v9 = vadd.f32 %v2108_v44, %v3895_v23  ;;  %v2106_v33 = vpop.permute.xlu1 %2105 }
 0x6e4   :  { %v2151_v1 = vadd.f32 %v2106_v33, %v3891_v4  ;;  %v3986_v50 = vld [vmem:[#allocation15 + $0x8] sm:$0xff] }
 0x6e5   :  { %2168 = vst.msk [vmem:[#allocation15 + $0x18] sm:$0xff] %vm1719_vm10, %v2152_v9 }
 0x6e6   :  { %2167 = vst.msk [vmem:[#allocation15 + $0x10] sm:$0xff] %vm1719_vm10, %v2151_v1 }
 0x6e8   :  { %v3984_v27 = vld [vmem:[#allocation15] sm:$0xff] }
 0x6ea   :  { %v2112_v38 = vpop.permute.xlu0 %2111 }
 0x6eb   :  { %v2154_v13 = vadd.f32 %v2112_v38, %v3903_v36  ;;  %v2110_v16 = vpop.permute.xlu1 %2109  ;;  %v2197_v36 = vmul.f32 %v3984_v27, %v3984_v27 }
 0x6ec   :  { %v2153_v57 = vadd.f32 %v2110_v16, %v3899_v61  ;;  %v2198_v61 = vmul.f32 %v3986_v50, %v3986_v50  ;;  %v4001_v22 = vld [vmem:[#allocation15 + $0x18] sm:$0xff] }
 0x6ed   :  { %2170 = vst.msk [vmem:[#allocation15 + $0x28] sm:$0xff] %vm1719_vm10, %v2154_v13  ;;  %v3988_v4 = vld [vmem:[#allocation15 + $0x10] sm:$0xff]  ;;  %v2213_v18 = vsel %vm1719_vm10, %v2197_v36, 0.0  ;;  %v2200_v54 = vmul.f32 %v4001_v22, %v4001_v22 }
 0x6ee   :  { %2169 = vst.msk [vmem:[#allocation15 + $0x20] sm:$0xff] %vm1719_vm10, %v2153_v57  ;;  %v2199_v56 = vmul.f32 %v3988_v4, %v3988_v4  ;;  %v2214_v10 = vsel %vm1719_vm10, %v2198_v61, 0.0 }
 0x6ef   :  { %v2215_v11 = vadd.f32 %v2214_v10, %v2213_v18 }
 0x6f2   :  { %v2116_v23 = vpop.permute.xlu0 %2115 }
 0x6f3   :  { %v2156_v48 = vadd.f32 %v2116_v23, %v3911_v32  ;;  %v2114_v31 = vpop.permute.xlu1 %2113 }
 0x6f4   :  { %v2155_v6 = vadd.f32 %v2114_v31, %v3907_v60  ;;  %v2216_v60 = vsel %vm1719_vm10, %v2199_v56, 0.0  ;;  %v4015_v5 = vld [vmem:[#allocation15 + $0x28] sm:$0xff] }
 0x6f5   :  { %2172 = vst.msk [vmem:[#allocation15 + $0x38] sm:$0xff] %vm1719_vm10, %v2156_v48  ;;  %v4003_v32 = vld [vmem:[#allocation15 + $0x20] sm:$0xff]  ;;  %v2217_v63 = vadd.f32 %v2216_v60, %v2215_v11  ;;  %v2202_v17 = vmul.f32 %v4015_v5, %v4015_v5 }
 0x6f6   :  { %2171 = vst.msk [vmem:[#allocation15 + $0x30] sm:$0xff] %vm1719_vm10, %v2155_v6  ;;  %v2201_v62 = vmul.f32 %v4003_v32, %v4003_v32 }
 0x6f7   :  { %v2222_v55 = vsel %vm1719_vm10, %v2202_v17, 0.0 }
 0x6f8   :  { %v2220_v30 = vsel %vm1719_vm10, %v2201_v62, 0.0 }
 0x6fa   :  { %v2120_v8 = vpop.permute.xlu0 %2119 }
 0x6fb   :  { %v2158_v14 = vadd.f32 %v2120_v8, %v3919_v40  ;;  %v2118_v7 = vpop.permute.xlu1 %2117  ;;  %v2218_v40 = vsel %vm1719_vm10, %v2200_v54, 0.0 }
 0x6fc   :  { %v2157_v21 = vadd.f32 %v2118_v7, %v3454_v39  ;;  %v2219_v25 = vadd.f32 %v2218_v40, %v2217_v63  ;;  %v4027_v49 = vld [vmem:[#allocation15 + $0x38] sm:$0xff] }
 0x6fd   :  { %2174 = vst.msk [vmem:[#allocation15 + $0x48] sm:$0xff] %vm1719_vm10, %v2158_v14  ;;  %v4017_v12 = vld [vmem:[#allocation15 + $0x30] sm:$0xff]  ;;  %v2204_v59 = vmul.f32 %v4027_v49, %v4027_v49 }
 0x6fe   :  { %2173 = vst.msk [vmem:[#allocation15 + $0x40] sm:$0xff] %vm1719_vm10, %v2157_v21  ;;  %v2203_v39 = vmul.f32 %v4017_v12, %v4017_v12  ;;  %v2221_v37 = vadd.f32 %v2220_v30, %v2219_v25 }
 0x6ff   :  { %v2226_v44 = vsel %vm1719_vm10, %v2204_v59, 0.0 }
 0x700   :  { %v2224_v29 = vsel %vm1719_vm10, %v2203_v39, 0.0  ;;  %v2223_v3 = vadd.f32 %v2222_v55, %v2221_v37 }
 0x702   :  { %v2124_v24 = vpop.permute.xlu0 %2123 }
 0x703   :  { %v2160_v34 = vadd.f32 %v2124_v24, %v3464_v42  ;;  %v2122_v43 = vpop.permute.xlu1 %2121 }
 0x704   :  { %v2159_v2 = vadd.f32 %v2122_v43, %v3462_v41  ;;  %v2225_v41 = vadd.f32 %v2224_v29, %v2223_v3  ;;  %v4039_v58 = vld [vmem:[#allocation15 + $0x48] sm:$0xff] }
 0x705   :  { %v4029_v15 = vld [vmem:[#allocation15 + $0x40] sm:$0xff]  ;;  %2176 = vst.msk [vmem:[#allocation15 + $0x58] sm:$0xff] %vm1719_vm10, %v2160_v34  ;;  %v2206_v38 = vmul.f32 %v4039_v58, %v4039_v58 }
 0x706   :  { %2175 = vst.msk [vmem:[#allocation15 + $0x50] sm:$0xff] %vm1719_vm10, %v2159_v2  ;;  %v2205_v42 = vmul.f32 %v4029_v15, %v4029_v15  ;;  %v2227_v1 = vadd.f32 %v2226_v44, %v2225_v41 }
 0x707   :  { %v2230_v57 = vsel %vm1719_vm10, %v2206_v38, 0.0 }
 0x708   :  { %v2228_v9 = vsel %vm1719_vm10, %v2205_v42, 0.0 }
 0x709   :  { %v2229_v13 = vadd.f32 %v2228_v9, %v2227_v1 }
 0x70a   :  { %v2128_v45 = vpop.permute.xlu0 %2127 }
 0x70b   :  { %v2162_v28 = vadd.f32 %v2128_v45, %v3472_v47  ;;  %v2126_v26 = vpop.permute.xlu1 %2125  ;;  %v2231_v31 = vadd.f32 %v2230_v57, %v2229_v13 }
 0x70c   :  { %v2161_v53 = vadd.f32 %v2126_v26, %v3470_v46  ;;  %v2192_v16 = vld [vmem:[#allocation15 + $0x58] sm:$0xff] }
 0x70d   :  { %2178 = vst.msk [vmem:[#allocation15 + $0x68] sm:$0xff] %vm1719_vm10, %v2162_v28  ;;  %v4046_v33 = vld [vmem:[#allocation15 + $0x50] sm:$0xff]  ;;  %v2208_v6 = vmul.f32 %v2192_v16, %v2192_v16 }
 0x70e   :  { %2177 = vst.msk [vmem:[#allocation15 + $0x60] sm:$0xff] %vm1719_vm10, %v2161_v53  ;;  %v2207_v47 = vmul.f32 %v4046_v33, %v4046_v33 }
 0x70f   :  { %v2234_v8 = vsel %vm1719_vm10, %v2208_v6, 0.0 }
 0x710   :  { %v2232_v23 = vsel %vm1719_vm10, %v2207_v47, 0.0 }
 0x711   :  { %v2233_v18 = vadd.f32 %v2232_v23, %v2231_v31 }
 0x712   :  { %v2132_v46 = vpop.permute.xlu0 %2131 }
 0x713   :  { %v2164_v48 = vadd.f32 %v2132_v46, %v3480_v52  ;;  %v2130_v36 = vpop.permute.xlu1 %2129  ;;  %v2235_v14 = vadd.f32 %v2234_v8, %v2233_v18 }
 0x714   :  { %v2163_v61 = vadd.f32 %v2130_v36, %v3478_v51  ;;  %v2194_v60 = vld [vmem:[#allocation15 + $0x68] sm:$0xff] }
 0x715   :  { %v2193_v56 = vld [vmem:[#allocation15 + $0x60] sm:$0xff]  ;;  %2180 = vst.msk [vmem:[#allocation15 + $0x78] sm:$0xff] %vm1719_vm10, %v2164_v48  ;;  %v2210_v7 = vmul.f32 %v2194_v60, %v2194_v60 }
 0x716   :  { %v2209_v10 = vmul.f32 %v2193_v56, %v2193_v56  ;;  %2179 = vst.msk [vmem:[#allocation15 + $0x70] sm:$0xff] %vm1719_vm10, %v2163_v61 }
 0x717   :  { %v2238_v51 = vsel %vm1719_vm10, %v2210_v7, 0.0 }
 0x718   :  { %v2236_v11 = vsel %vm1719_vm10, %v2209_v10, 0.0 }
 0x719   :  { %v2237_v52 = vadd.f32 %v2236_v11, %v2235_v14 }
 0x71b   :  { %v2239_v40 = vadd.f32 %v2238_v51, %v2237_v52  ;;  %v580_v51 = vrot.slane %v3623_v19, 4 }
 0x71c   :  { %v2196_v54 = vld [vmem:[#allocation15 + $0x78] sm:$0xff] }
 0x71d   :  { %v2195_v62 = vld [vmem:[#allocation15 + $0x70] sm:$0xff]  ;;  %v2212_v21 = vmul.f32 %v2196_v54, %v2196_v54 }
 0x71e   :  { %v2211_v63 = vmul.f32 %v2195_v62, %v2195_v62 }
 0x71f   :  { %v2242_v17 = vsel %vm1719_vm10, %v2212_v21, 0.0  ;;  %v571_v21 = vrot.slane %v3620_v35, 4 }
 0x720   :  { %v2240_v30 = vsel %vm1719_vm10, %v2211_v63, 0.0 }
 0x721   :  { %v2241_v25 = vadd.f32 %v2240_v30, %v2239_v40 }
 0x723   :  { %v2243_v39 = vadd.f32 %v2242_v17, %v2241_v25  ;;  %v572_v17 = vadd.f32 %v571_v21, %v3620_v35 }
 0x725   :  { %v2244_v24 = vrot.slane %v2243_v39, 4 }
 0x727   :  { %v2245_v37 = vadd.f32 %v2244_v24, %v2243_v39  ;;  %v581_v39 = vadd.f32 %v580_v51, %v3623_v19 }
 0x729   :  { %v2246_v34 = vrot.slane %v2245_v37, 2 }
 0x72b   :  { %v2247_v43 = vadd.f32 %v2246_v34, %v2245_v37 }
 0x72d   :  { %v2248_v2 = vrot.slane %v2247_v43, 1 }
 0x72f   :  { %v2249_v55 = vadd.f32 %v2248_v2, %v2247_v43  ;;  %v573_v43 = vrot.slane %v572_v17, 2  ;;  %v582_v2 = vrot.slane %v581_v39, 2 }
 0x731   :  { %2932 = vrsqrt.f32 %v2249_v55  ;;  %vm2252_vm11 = vcmp.eq.f32.partialorder %v2249_v55, inf  ;;  %v2255_v59 = vand.u32 2147483648, %v2249_v55  ;;  %vm2254_vm12 = vcmp.eq.f32.partialorder %v2249_v55, 0.0 }
 0x73b   :  { %v2933_v29 = vpop.eup %2932 }
 0x73c   :  { %v2251_v3 = vmul.f32 %v2933_v29, %v2249_v55 }
 0x73e   :  { %v2253_v42 = vsel %vm2252_vm11, %v2249_v55, %v2251_v3  ;;  %v1593_v55 = vrot.slane %v3878_v20, 4 }
 0x73f   :  { %v2256_v41 = vsel %vm2254_vm12, %v2255_v59, %v2253_v42  ;;  %v574_v59 = vadd.f32 %v573_v43, %v572_v17  ;;  %v583_v42 = vadd.f32 %v582_v2, %v581_v39 }
 0x740   :  { %2934 = vrcp.f32 %v2256_v41  ;;  %v1594_v41 = vadd.f32 %v1593_v55, %v3878_v20 }
 0x741   :  { %v584_v35 = vrot.slane %v583_v42, 1 }
 0x74a   :  { %v2935_v45 = vpop.eup %2934 }
 0x74b   :  { %v2272_v28 = vmul.f32 %v2935_v45, %v2195_v62  ;;  %v2258_v26 = vmul.f32 %v2935_v45, %v3984_v27  ;;  %v2259_v53 = vmul.f32 %v2935_v45, %v3986_v50  ;;  %v2260_v44 = vmul.f32 %v2935_v45, %v3988_v4 }
 0x74c   :  { %v2261_v9 = vmul.f32 %v2935_v45, %v4001_v22  ;;  %v2262_v1 = vmul.f32 %v2935_v45, %v4003_v32  ;;  %v2263_v38 = vmul.f32 %v2935_v45, %v4015_v5  ;;  %v2264_v47 = vmul.f32 %v2935_v45, %v4017_v12 }
 0x74d   :  { %2288 = vst.msk [vmem:[#allocation15 + $0x70] sm:$0xff] %vm1719_vm10, %v2272_v28  ;;  %v2265_v13 = vmul.f32 %v2935_v45, %v4027_v49  ;;  %v2266_v46 = vmul.f32 %v2935_v45, %v4029_v15  ;;  %v2267_v27 = vmul.f32 %v2935_v45, %v4039_v58  ;;  %v2268_v50 = vmul.f32 %v2935_v45, %v4046_v33 }
 0x74e   :  { %2275 = vst.msk [vmem:[#allocation15 + $0x8] sm:$0xff] %vm1719_vm10, %v2259_v53  ;;  %2276 = vst.msk [vmem:[#allocation15 + $0x10] sm:$0xff] %vm1719_vm10, %v2260_v44  ;;  %v2269_v4 = vmul.f32 %v2935_v45, %v2192_v16  ;;  %v2270_v22 = vmul.f32 %v2935_v45, %v2193_v56  ;;  %v2271_v32 = vmul.f32 %v2935_v45, %v2194_v60  ;;  %v2290_v12 = vsel %vm1719_vm10, %v2258_v26, 0.0 }
 0x74f   :  { %2274 = vst.msk [vmem:[#allocation15] sm:$0xff] %vm1719_vm10, %v2258_v26  ;;  %v2273_v5 = vmul.f32 %v2935_v45, %v2196_v54  ;;  %2277 = vst.msk [vmem:[#allocation15 + $0x18] sm:$0xff] %vm1719_vm10, %v2261_v9  ;;  %v2291_v49 = vsel %vm1719_vm10, %v2259_v53, 0.0  ;;  %v2293_v58 = vsel %vm1719_vm10, %v2260_v44, 0.0  ;;  %v2295_v16 = vsel %vm1719_vm10, %v2261_v9, 0.0 }
 0x750   :  { %2278 = vst.msk [vmem:[#allocation15 + $0x20] sm:$0xff] %vm1719_vm10, %v2262_v1  ;;  %2279 = vst.msk [vmem:[#allocation15 + $0x28] sm:$0xff] %vm1719_vm10, %v2263_v38  ;;  %v2292_v15 = vadd.f32 %v2291_v49, %v2290_v12  ;;  %v2297_v23 = vsel %vm1719_vm10, %v2262_v1, 0.0  ;;  %v2299_v31 = vsel %vm1719_vm10, %v2263_v38, 0.0  ;;  %v2301_v6 = vsel %vm1719_vm10, %v2264_v47, 0.0 }
 0x751   :  { %2280 = vst.msk [vmem:[#allocation15 + $0x30] sm:$0xff] %vm1719_vm10, %v2264_v47  ;;  %2281 = vst.msk [vmem:[#allocation15 + $0x38] sm:$0xff] %vm1719_vm10, %v2265_v13  ;;  %v2303_v56 = vsel %vm1719_vm10, %v2265_v13, 0.0  ;;  %v2305_v10 = vsel %vm1719_vm10, %v2266_v46, 0.0  ;;  %v2307_v8 = vsel %vm1719_vm10, %v2267_v27, 0.0  ;;  %v2309_v14 = vsel %vm1719_vm10, %v2268_v50, 0.0 }
 0x752   :  { %2282 = vst.msk [vmem:[#allocation15 + $0x40] sm:$0xff] %vm1719_vm10, %v2266_v46  ;;  %2283 = vst.msk [vmem:[#allocation15 + $0x48] sm:$0xff] %vm1719_vm10, %v2267_v27  ;;  %v2294_v33 = vadd.f32 %v2293_v58, %v2292_v15  ;;  %v2311_v52 = vsel %vm1719_vm10, %v2269_v4, 0.0  ;;  %v2313_v62 = vsel %vm1719_vm10, %v2270_v22, 0.0  ;;  %v2315_v40 = vsel %vm1719_vm10, %v2271_v32, 0.0 }
 0x753   :  { %2284 = vst.msk [vmem:[#allocation15 + $0x50] sm:$0xff] %vm1719_vm10, %v2268_v50  ;;  %2285 = vst.msk [vmem:[#allocation15 + $0x58] sm:$0xff] %vm1719_vm10, %v2269_v4  ;;  %v2317_v25 = vsel %vm1719_vm10, %v2272_v28, 0.0  ;;  %v2319_v37 = vsel %vm1719_vm10, %v2273_v5, 0.0  ;;  %v575_v26 = vrot.slane %v574_v59, 1  ;;  %v1595_v53 = vrot.slane %v1594_v41, 2 }
 0x754   :  { %2286 = vst.msk [vmem:[#allocation15 + $0x60] sm:$0xff] %vm1719_vm10, %v2270_v22  ;;  %2287 = vst.msk [vmem:[#allocation15 + $0x68] sm:$0xff] %vm1719_vm10, %v2271_v32  ;;  %v2296_v57 = vadd.f32 %v2295_v16, %v2294_v33  ;;  %v4117_v1 = vadd.f32 %v584_v35, %v583_v42  ;;  %v3167_v58 = vmov 1966171168  }
 0x755   :  { %2289 = vst.msk [vmem:[#allocation15 + $0x78] sm:$0xff] %vm1719_vm10, %v2273_v5  ;;  %v4115_v9 = vadd.f32 %v575_v26, %v574_v59  ;;  %v1596_v38 = vadd.f32 %v1595_v53, %v1594_v41  ;;  %v603_v33 = vunpack.c.l.s4 %v3167_v58 }
 0x756   :  { %v2298_v48 = vadd.f32 %v2297_v23, %v2296_v57 }
 0x757   :  { %v586_v20 = vmin.f32 %v4115_v9, %v4117_v1  ;;  %v589_v46 = vmax.f32 %v4115_v9, %v4117_v1  ;;  %v1597_v27 = vrot.slane %v1596_v38, 1 }
 0x758   :  { %v2300_v36 = vadd.f32 %v2299_v31, %v2298_v48  ;;  %v604_v31 = vunpack.c.0.s8 %v603_v33 }
 0x759   :  { %v4127_v50 = vadd.f32 %v1597_v27, %v1596_v38 }
 0x75a   :  { %v2302_v61 = vadd.f32 %v2301_v6, %v2300_v36  ;;  %v446_v36 = vld [vmem:[#allocation5] sm:$0xff]  ;;  %v447_v6 = vld [vmem:[#allocation5 + $0x8] sm:$0xff] }
 0x75b   :  { %454 = vst [vmem:[#allocation12] sm:$0xff] %v446_v36  ;;  %455 = vst [vmem:[#allocation12 + $0x8] sm:$0xff] %v447_v6 }
 0x75c   :  { %v2304_v18 = vadd.f32 %v2303_v56, %v2302_v61  ;;  %v448_v61 = vld [vmem:[#allocation5 + $0x20] sm:$0xff] }
 0x75d   :  { %456 = vst [vmem:[#allocation12 + $0x20] sm:$0xff] %v448_v61 }
 0x75e   :  { %v2306_v60 = vadd.f32 %v2305_v10, %v2304_v18  ;;  %v449_v18 = vld [vmem:[#allocation5 + $0x28] sm:$0xff]  ;;  %v450_v10 = vld [vmem:[#allocation5 + $0x40] sm:$0xff] }
 0x75f   :  { %457 = vst [vmem:[#allocation12 + $0x28] sm:$0xff] %v449_v18  ;;  %458 = vst [vmem:[#allocation12 + $0x40] sm:$0xff] %v450_v10 }
 0x760   :  { %v2308_v11 = vadd.f32 %v2307_v8, %v2306_v60  ;;  %v451_v60 = vld [vmem:[#allocation5 + $0x48] sm:$0xff]  ;;  %v452_v8 = vld [vmem:[#allocation5 + $0x60] sm:$0xff] }
 0x761   :  { %459 = vst [vmem:[#allocation12 + $0x48] sm:$0xff] %v451_v60  ;;  %460 = vst [vmem:[#allocation12 + $0x60] sm:$0xff] %v452_v8 }
 0x762   :  { %v2310_v7 = vadd.f32 %v2309_v14, %v2308_v11  ;;  %v453_v11 = vld [vmem:[#allocation5 + $0x68] sm:$0xff]  ;;  %v1165_v14 = vld [vmem:[#allocation7] sm:$0xff] }
 0x763   :  { %461 = vst [vmem:[#allocation12 + $0x68] sm:$0xff] %v453_v11  ;;  %1197 = vst [vmem:[#allocation14] sm:$0xff] %v1165_v14 }
 0x764   :  { %v2312_v54 = vadd.f32 %v2311_v52, %v2310_v7  ;;  %v1166_v7 = vld [vmem:[#allocation7 + $0x10] sm:$0xff]  ;;  %v1167_v52 = vld [vmem:[#allocation7 + $0x20] sm:$0xff] }
 0x766   :  { %v2314_v63 = vadd.f32 %v2313_v62, %v2312_v54  ;;  %v1168_v54 = vld [vmem:[#allocation7 + $0x30] sm:$0xff]  ;;  %v4298_v62 = vld [vmem:[#allocation26_spill] sm:$0xff] }
 0x767   :  { %v4145_v21 = vsub.s32 %v604_v31, %v4298_v62 }
 0x768   :  { %v2316_v30 = vadd.f32 %v2315_v40, %v2314_v63 }
 0x76a   :  { %v2318_v24 = vadd.f32 %v2317_v25, %v2316_v30 }
 0x76c   :  { %v2320_v34 = vadd.f32 %v2319_v37, %v2318_v24 }
 0x76e   :  { %v2321_v29 = vrot.slane %v2320_v34, 4 }
 0x770   :  { %v2322_v3 = vadd.f32 %v2321_v29, %v2320_v34 }
 0x772   :  { %v2323_v45 = vrot.slane %v2322_v3, 2 }
 0x774   :  { %v2324_v28 = vadd.f32 %v2323_v45, %v2322_v3 }
 0x776   :  { %v2325_v19 = vrot.slane %v2324_v28, 1 }
 0x778   :  { %v4113_v44 = vadd.f32 %v2325_v19, %v2324_v28 }
 0x77a   :  { %v2330_v47 = vsel %vm1719_vm10, %v4113_v44, -inf  ;;  %v2327_v13 = vsel %vm1719_vm10, %v4113_v44, inf }
 0x77b   :  { %2331 = vmax.xlane.f32.xlu0 %v2330_v47  ;;  %2328 = vmin.xlane.f32.xlu1 %v2327_v13 }
 0x77f   :  { %587 = vmin.xlane.f32.xlu0 %v586_v20  ;;  %590 = vmax.xlane.f32.xlu1 %v589_v46 }
 0x783   :  { %1601 = vmax.xlane.f32.xlu1 %v4127_v50  ;;  %1599 = vmin.xlane.f32.xlu0 %v4127_v50 }
 0x808   :  { %v2332_v4 = vpop.xlane.xlu0 %2331  ;;  %v4131_v22 = vpop.xlane.xlu1 %2328 }
 0x809   :  { %v2334_v32 = vsub.f32 %v2332_v4, %v4131_v22  ;;  %v2333_v51 = vsub.f32 %v4113_v44, %v4131_v22 }
 0x80b   :  { %v2335_v5 = vadd.f32 1e-08, %v2334_v32 }
 0x80c   :  { %v4134_v12 = vpop.xlane.xlu0 %587  ;;  %v591_v49 = vpop.xlane.xlu1 %590 }
 0x80d   :  { %2936 = vrcp.f32 %v2335_v5  ;;  %v594_v15 = vsub.f32 %v591_v49, %v4134_v12 }
 0x80f   :  { %v595_v16 = vadd.f32 1e-08, %v594_v15 }
 0x810   :  { %v1602_v57 = vpop.xlane.xlu1 %1601  ;;  %v4137_v23 = vpop.xlane.xlu0 %1599 }
 0x811   :  { %2938 = vrcp.f32 %v595_v16  ;;  %v1604_v48 = vsub.f32 %v1602_v57, %v4137_v23 }
 0x813   :  { %v1605_v56 = vadd.f32 1e-08, %v1604_v48 }
 0x815   :  { %2940 = vrcp.f32 %v1605_v56 }
 0x816   :  { %3063 = shalt.err (!%p3060_p2)
}
 0x817   :  { %s3064_s28 = scalar_lea.hbm %s4271_s10, 2048 }
 0x818   :  { %p3065_p3 = scmp.ne.s32.totalorder %s4271_s10, %s3064_s28  ;;  %p3068_p4 = scmp.lt.u32.totalorder %s3064_s28, %s4271_s10 }
 0x81a   :  { %p3070_p5 = pnand %p3068_p4, %p3065_p3 }
 0x81c   :  { %3073 = shalt.err (!%p3070_p5)
}
 0x81d   :  { %2473 = dma.vmem_to_hbm [thread:$0]  %s4140_s16, 2048, %s4271_s10, [#allocation13], %s3153_s18, %s3153_s18, %s3154_s19   ;;  %v1169_v63 = vld [vmem:[#allocation7 + $0x40] sm:$0xff]  ;;  %v1170_v40 = vld [vmem:[#allocation7 + $0x50] sm:$0xff]  ;;  %1198 = vst [vmem:[#allocation14 + $0x10] sm:$0xff] %v1166_v7  ;;  %1199 = vst [vmem:[#allocation14 + $0x20] sm:$0xff] %v1167_v52  ;;  %v2937_v25 = vpop.eup %2936 }
 0x81e   :  { %v1171_v30 = vld [vmem:[#allocation7 + $0x60] sm:$0xff]  ;;  %1200 = vst [vmem:[#allocation14 + $0x30] sm:$0xff] %v1168_v54  ;;  %s3074_s14 = scalar_lea.vmem %s4142_s20, 128  ;;  %p3079_p7 = scmp.lt.s32.totalorder %s4142_s20, %s4142_s20 }
 0x81f   :  { %p3075_p6 = scmp.ne.s32.totalorder %s4142_s20, %s3074_s14  ;;  %p3080_p8 = scmp.lt.s32.totalorder %s3074_s14, %s3074_s14 }
 0x821   :  { %p3081_p9 = por %p3080_p8, %p3079_p7 }
 0x823   :  { %p3082_p10 = pnand %p3081_p9, %p3075_p6 }
 0x825   :  { %3085 = shalt.err (!%p3082_p10)
}
 0x826   :  { %s3086_s6 = scalar_lea.hbm %s4270_s9, 128 }
 0x827   :  { %p3087_p11 = scmp.ne.s32.totalorder %s4270_s9, %s3086_s6  ;;  %p3090_p12 = scmp.lt.u32.totalorder %s3086_s6, %s4270_s9 }
 0x829   :  { %p3092_p13 = pnand %p3090_p12, %p3087_p11 }
 0x82b   :  { %3095 = shalt.err (!%p3092_p13)
}
 0x82c   :  { %2461 = dma.vmem_to_hbm [thread:$0]  %s4142_s20, 128, %s4270_s9, [#allocation4]   ;;  %v1172_v17 = vld [vmem:[#allocation7 + $0x70] sm:$0xff]  ;;  %v1173_v39 = vld [vmem:[#allocation7 + $0x80] sm:$0xff]  ;;  %1201 = vst [vmem:[#allocation14 + $0x40] sm:$0xff] %v1169_v63  ;;  %1202 = vst [vmem:[#allocation14 + $0x50] sm:$0xff] %v1170_v40  ;;  %v2337_v37 = vmul.f32 %v2937_v25, %v2333_v51  ;;  %v592_v42 = vsub.f32 %v4115_v9, %v4134_v12  ;;  %v593_v41 = vsub.f32 %v4117_v1, %v4134_v12  ;;  %v2939_v35 = vpop.eup %2938 }
 0x82d   :  { %v1174_v24 = vld [vmem:[#allocation7 + $0x90] sm:$0xff]  ;;  %1203 = vst [vmem:[#allocation14 + $0x60] sm:$0xff] %v1171_v30  ;;  %v1175_v34 = vld [vmem:[#allocation7 + $0xa0] sm:$0xff]  ;;  %1204 = vst [vmem:[#allocation14 + $0x70] sm:$0xff] %v1172_v17  ;;  %s3170_s9 = smov [#allocation15]   ;;  %s3171_s20 = smov [#allocation14]  }
 0x82e   :  { %v1176_v43 = vld [vmem:[#allocation7 + $0xb0] sm:$0xff]  ;;  %v1177_v2 = vld [vmem:[#allocation7 + $0xc0] sm:$0xff]  ;;  %1205 = vst [vmem:[#allocation14 + $0x80] sm:$0xff] %v1173_v39  ;;  %1206 = vst [vmem:[#allocation14 + $0x90] sm:$0xff] %v1174_v24  ;;  %s2491_s17 = sshll.u32 %s3170_s9, 4  ;;  %v2345_v59 = vrot.slane %v2337_v37, %v4145_v21  ;;  %s4191_s22 = sshll.u32 %s3171_s20, 4  ;;  %s2492_s17 = int_to_ptr.vmem [resolvable:$true] %s2491_s17  ;;  %s2480_s22 = int_to_ptr.vmem [resolvable:$true] %s4191_s22 }
 0x82f   :  { %v1178_v55 = vld [vmem:[#allocation7 + $0xd0] sm:$0xff]  ;;  %v1179_v29 = vld [vmem:[#allocation7 + $0xe0] sm:$0xff]  ;;  %1207 = vst [vmem:[#allocation14 + $0xa0] sm:$0xff] %v1175_v34  ;;  %1208 = vst [vmem:[#allocation14 + $0xb0] sm:$0xff] %v1176_v43  ;;  %s3096_s25 = scalar_lea.vmem %s2492_s17, 2048  ;;  %p3101_p1 = scmp.lt.s32.totalorder %s2492_s17, %s2492_s17 }
 0x830   :  { %v1180_v3 = vld [vmem:[#allocation7 + $0xf0] sm:$0xff]  ;;  %1209 = vst [vmem:[#allocation14 + $0xc0] sm:$0xff] %v1177_v2  ;;  %v1181_v45 = vld [vmem:[#allocation7 + $0x100] sm:$0xff]  ;;  %1210 = vst [vmem:[#allocation14 + $0xd0] sm:$0xff] %v1178_v55  ;;  %p3097_p0 = scmp.ne.s32.totalorder %s2492_s17, %s3096_s25  ;;  %p3102_p2 = scmp.lt.s32.totalorder %s3096_s25, %s3096_s25 }
 0x831   :  { %v1182_v28 = vld [vmem:[#allocation7 + $0x110] sm:$0xff]  ;;  %v1183_v26 = vld [vmem:[#allocation7 + $0x120] sm:$0xff]  ;;  %1211 = vst [vmem:[#allocation14 + $0xe0] sm:$0xff] %v1179_v29  ;;  %1212 = vst [vmem:[#allocation14 + $0xf0] sm:$0xff] %v1180_v3 }
 0x832   :  { %v1184_v53 = vld [vmem:[#allocation7 + $0x130] sm:$0xff]  ;;  %v1185_v19 = vld [vmem:[#allocation7 + $0x140] sm:$0xff]  ;;  %1213 = vst [vmem:[#allocation14 + $0x100] sm:$0xff] %v1181_v45  ;;  %1214 = vst [vmem:[#allocation14 + $0x110] sm:$0xff] %v1182_v28  ;;  %p3103_p3 = por %p3102_p2, %p3101_p1 }
 0x833   :  { %v1186_v44 = vld [vmem:[#allocation7 + $0x150] sm:$0xff]  ;;  %1215 = vst [vmem:[#allocation14 + $0x120] sm:$0xff] %v1183_v26 }
 0x834   :  { %p3104_p4 = pnand %p3103_p3, %p3097_p0 }
 0x836   :  { %3107 = shalt.err (!%p3104_p4)
}
 0x837   :  { %s3108_s29 = scalar_lea.hbm %s4273_s12, 2048 }
 0x838   :  { %p3109_p5 = scmp.ne.s32.totalorder %s4273_s12, %s3108_s29  ;;  %p3112_p6 = scmp.lt.u32.totalorder %s3108_s29, %s4273_s12 }
 0x83a   :  { %p3114_p7 = pnand %p3112_p6, %p3109_p5 }
 0x83c   :  { %3117 = shalt.err (!%p3114_p7)
}
 0x83d   :  { %2497 = dma.vmem_to_hbm [thread:$0]  %s2492_s17, 2048, %s4273_s12, [#allocation16], %s3156_s1, %s3156_s1, %s3157_s26   ;;  %v597_v9 = vmul.f32 %v2939_v35, %v592_v42  ;;  %v598_v1 = vmul.f32 %v2939_v35, %v593_v41  ;;  %v2352_v38 = vrot.slane %v2345_v59, %v4145_v21  ;;  %v1187_v47 = vld [vmem:[#allocation7 + $0x160] sm:$0xff]  ;;  %v1188_v13 = vld [vmem:[#allocation7 + $0x170] sm:$0xff]  ;;  %1216 = vst [vmem:[#allocation14 + $0x130] sm:$0xff] %v1184_v53  ;;  %1217 = vst [vmem:[#allocation14 + $0x140] sm:$0xff] %v1185_v19  ;;  %v2941_v15 = vpop.eup %2940  ;;  %v4299_v58 = vlaneseq }
 0x83e   :  { %v1189_v20 = vld [vmem:[#allocation7 + $0x180] sm:$0xff]  ;;  %1218 = vst [vmem:[#allocation14 + $0x150] sm:$0xff] %v1186_v44  ;;  %v1190_v46 = vld [vmem:[#allocation7 + $0x190] sm:$0xff]  ;;  %1219 = vst [vmem:[#allocation14 + $0x160] sm:$0xff] %v1187_v47  ;;  %v1603_v32 = vsub.f32 %v4127_v50, %v4137_v23  ;;  %s3118_s12 = scalar_lea.vmem %s2480_s22, 8192  ;;  %p3123_p9 = scmp.lt.s32.totalorder %s2480_s22, %s2480_s22 }
 0x83f   :  { %v1191_v27 = vld [vmem:[#allocation7 + $0x1a0] sm:$0xff]  ;;  %v1192_v4 = vld [vmem:[#allocation7 + $0x1b0] sm:$0xff]  ;;  %1220 = vst [vmem:[#allocation14 + $0x170] sm:$0xff] %v1188_v13  ;;  %1221 = vst [vmem:[#allocation14 + $0x180] sm:$0xff] %v1189_v20  ;;  %v601_v22 = vcombine.low %v597_v9, %v598_v1  ;;  %2353 = vrot.lane.b32.xlu0 %v2352_v38, %s3166_s5  ;;  %vm4214_vm13 = vcmp.lt.s32.totalorder %v4299_v58, 128  ;;  %vm4220_vm14 = vcmp.lt.s32.totalorder %v4299_v58, 256  ;;  %p3119_p8 = scmp.ne.s32.totalorder %s2480_s22, %s3118_s12  ;;  %p3124_p10 = scmp.lt.s32.totalorder %s3118_s12, %s3118_s12 }
 0x840   :  { %v1193_v5 = vld [vmem:[#allocation7 + $0x1c0] sm:$0xff]  ;;  %v1194_v12 = vld [vmem:[#allocation7 + $0x1d0] sm:$0xff]  ;;  %1222 = vst [vmem:[#allocation14 + $0x190] sm:$0xff] %v1190_v46  ;;  %1223 = vst [vmem:[#allocation14 + $0x1a0] sm:$0xff] %v1191_v27  ;;  %v1607_v57 = vmul.f32 %v2941_v15, %v1603_v32 }
 0x841   :  { %v1195_v49 = vld [vmem:[#allocation7 + $0x1e0] sm:$0xff]  ;;  %1224 = vst [vmem:[#allocation14 + $0x1b0] sm:$0xff] %v1192_v4  ;;  %v1196_v16 = vld [vmem:[#allocation7 + $0x1f0] sm:$0xff]  ;;  %1225 = vst [vmem:[#allocation14 + $0x1c0] sm:$0xff] %v1193_v5  ;;  %v608_v50 = vrot.slane %v601_v22, %v4145_v21  ;;  %p3125_p11 = por %p3124_p10, %p3123_p9 }
 0x842   :  { %1226 = vst [vmem:[#allocation14 + $0x1d0] sm:$0xff] %v1194_v12  ;;  %1227 = vst [vmem:[#allocation14 + $0x1e0] sm:$0xff] %v1195_v49 }
 0x843   :  { %1228 = vst [vmem:[#allocation14 + $0x1f0] sm:$0xff] %v1196_v16  ;;  %p3126_p12 = pnand %p3125_p11, %p3119_p8 }
 0x845   :  { %3129 = shalt.err (!%p3126_p12)
}
 0x846   :  { %s3130_s5 = scalar_lea.hbm %s4272_s11, 8192 }
 0x847   :  { %p3131_p13 = scmp.ne.s32.totalorder %s4272_s11, %s3130_s5  ;;  %p3134_p0 = scmp.lt.u32.totalorder %s3130_s5, %s4272_s11 }
 0x849   :  { %p3136_p1 = pnand %p3134_p0, %p3131_p13 }
 0x84b   :  { %3139 = shalt.err (!%p3136_p1)
}
 0x84c   :  { %2485 = dma.vmem_to_hbm [thread:$0]  %s2480_s22, 8192, %s4272_s11, [#allocation13], %s3160_s0, %s3160_s0, %s3161_s21   ;;  %v615_v48 = vrot.slane %v608_v50, %v4145_v21  ;;  %vm2359_vm15 = vcmp.ge.s32.totalorder %v4299_v58, 64  ;;  %vm2356_vm0 = vcmp.lt.s32.totalorder %v4299_v58, 64 }
 0x84d   :  { %1610 = vst.msk [vmem:[%s4274_s13 + $0x2] sm:$0x1] %vm4214_vm13, %v1607_v57  ;;  %vm2360_vm1 = vmand %vm2359_vm15, %vm4214_vm13 }
 0x84e   :  { %621 = vst.msk [vmem:[%s4274_s13] sm:$0x3] %vm4220_vm14, %v615_v48 }
 0x8b1   :  { %v2354_v31 = vpop.permute.xlu0 %2353 }
 0x8b2   :  { %2358 = vst.msk [vmem:[%s4274_s13 + $0x3] sm:$0x1] %vm2356_vm0, %v2354_v31 }
 0x8b3   :  { %2361 = vst.msk [vmem:[%s4274_s13 + $0x3] sm:$0x1] %vm2360_vm1, %v4294_v0 }
 0x8b4   :  { %3146 = dma.done.wait [#allocation4], 128  }
 0x8b5   :  { %3147 = vsyncadd [#allocation4], 4294967168 }
 0x8b6   :  { %3148 = dma.done.wait [#allocation13], 10240  }
 0x8b7   :  { %3149 = vsyncadd [#allocation13], 4294957056 }
 0x8b8   :  { %3150 = dma.done.wait [#allocation16], 2048  }
 0x8b9   :  { %3151 = vsyncadd [#allocation16], 4294965248 }
 0x8ba   :  { %2514 = vsyncpa [#allocation3], 1 }
 0x8bb   :  { %2515 = vsyncpa [#allocation6], 1 }
 0x8bc   :  { %2516 = vsyncpa [#allocation9], 1 }
 0x8bd   :  { %2517 = vsyncpa [#allocation4], 1 }
 0x8be   :  { %2518 = vsyncpa [#allocation13], 1 }
 0x8bf   :  { %2519 = vsyncpa [#allocation16], 1 }

</bundles_post_ra>
